<compile_context>
chip_gen: v6e
topology: v6e:2x2x1
jax: 0.10.0
libtpu: 0.0.40
codegen_flags: <defaults>
</compile_context>

<pallas_src>
import functools
import math

import jax
import jax.numpy as jnp
import numpy as np
from jax.experimental import pallas as pl
from jax.experimental.pallas import tpu as pltpu

_SQRT2_INV = 0.7071067811865476


def _gelu(v):
    # Exact (erf-based) GELU, matching torch.nn.GELU() default.
    return 0.5 * v * (1.0 + jax.lax.erf(v * _SQRT2_INV))


def _round_up(n, m):
    return ((n + m - 1) // m) * m


def _cond_block_kernel(x_ref, cond_ref, mask_ref,
                       wc_ref,
                       wds_ref, bds_ref,
                       g1w_ref, g1b_ref,
                       wc1_ref, bc1_ref,
                       g2w_ref, g2b_ref,
                       wc2_ref, bc2_ref,
                       wres_ref, bres_ref,
                       out_ref,
                       patch_ref,
                       *, offsets, lp, cin_p, cout_p, cmid_p,
                       n_gn1, n_gn2, eps=1e-5):
    x = x_ref[0]                  # (cin_p, Lp): zero halo/tail/padded channels
    mask = mask_ref[...]          # (1, Lp): 1.0 on interior pixels, else 0.0

    def conv3x3(v, w_ref, b_ref, cp):
        # im2col: 9 lane-rotated copies stacked on sublanes -> ONE MXU matmul.
        # v has zero halo, so shifted taps never mix neighbouring image rows;
        # lane rotation wrap-around only affects halo outputs (discarded).
        for t, off in enumerate(offsets):
            shifted = v if off == 0 else pltpu.roll(v, (-off) % lp, axis=1)
            patch_ref[t * cp:(t + 1) * cp, :] = shifted
        patches = patch_ref[0:9 * cp, :]                      # (9*cp, Lp)
        return jnp.dot(w_ref[...], patches,
                       preferred_element_type=jnp.float32) + b_ref[...]

    def groupnorm(v, g_ref, b_ref, inv_n):
        # Single-pass GroupNorm(1, C): sum + sum-of-squares over interior
        # pixels (mask zeroes halo / lane tail / padded channels).  The output
        # is re-masked so it is directly a valid (zero-halo) conv input.
        vm = v * mask
        s1 = jnp.sum(vm)
        s2 = jnp.sum(vm * vm)
        mean = s1 * inv_n
        var = s2 * inv_n - mean * mean
        inv = jax.lax.rsqrt(var + eps)
        return ((vm - mean) * inv * g_ref[...] + b_ref[...]) * mask

    # ---- h = ds_conv(x) ----------------------------------------------------
    h = conv3x3(x, wds_ref, bds_ref, cin_p)                    # (cout_p, Lp)

    # ---- scale, shift = GELU(Linear(cond)).chunk(2), merged weight ----------
    # rows [0:cout_p) -> scale, [cout_p:2*cout_p) -> shift (already on sublanes)
    ss = _gelu(jnp.sum(wc_ref[...] * cond_ref[0], axis=1, keepdims=True))
    scale = ss[:cout_p, :]
    shift = ss[cout_p:, :]
    h = h * (1.0 + scale) + shift

    # ---- conv block: GN -> Conv3x3 -> GELU -> GN -> Conv3x3 ------------------
    h = groupnorm(h, g1w_ref, g1b_ref, 1.0 / n_gn1)
    h = conv3x3(h, wc1_ref, bc1_ref, cout_p)                   # (cmid_p, Lp)
    h = _gelu(h)
    h = groupnorm(h, g2w_ref, g2b_ref, 1.0 / n_gn2)
    h = conv3x3(h, wc2_ref, bc2_ref, cmid_p)                   # (cout_p, Lp)

    # ---- residual 1x1 conv (if in_ch == out_ch the caller passes identity) ---
    res = jnp.dot(wres_ref[...], x, preferred_element_type=jnp.float32) \
        + bres_ref[...]
    out_ref[0] = (h + res).astype(out_ref.dtype)


def conditional_block_forward(x_nchw, cond_emb, p):
    """x_nchw: (B, Cin, H, W) f32; cond_emb: (B, cond_dim) f32; p: param dict
    (same layout as ref_forward)."""
    B, Cin, H, W = x_nchw.shape
    cond_dim = cond_emb.shape[1]
    Cout = p["w_ds"].shape[3]
    Cmid = p["w_c1"].shape[3]

    cin_p, cout_p, cmid_p = (_round_up(c, 8) for c in (Cin, Cout, Cmid))
    Hp, Wp = H + 2, W + 2
    L = Hp * Wp
    Lp = _round_up(L, 128)
    cp_max = max(cin_p, cout_p, cmid_p)

    # ---- glue: channel pad to sublane multiple, spatial halo + lane pad ------
    xp = jnp.pad(x_nchw, ((0, 0), (0, cin_p - Cin), (1, 1), (1, 1)))
    xp = jnp.pad(xp.reshape(B, cin_p, L), ((0, 0), (0, 0), (0, Lp - L)))
    xp = xp.astype(jnp.float32)

    cond3 = cond_emb.reshape(B, 1, cond_dim).astype(jnp.float32)

    mask2d = jnp.zeros((Hp, Wp), jnp.float32).at[1:H + 1, 1:W + 1].set(1.0)
    mask = jnp.pad(mask2d.reshape(1, L), ((0, 0), (0, Lp - L)))

    def pack_conv(w_hwio, ci_p, co_p):
        kh, kw, ci, co = w_hwio.shape
        w = jnp.pad(w_hwio, ((0, 0), (0, 0), (0, ci_p - ci), (0, co_p - co)))
        # (Cout_p, 9*Cin_p); column index = (ky*3 + kx) * Cin_p + c
        return jnp.transpose(w, (3, 0, 1, 2)).reshape(co_p, kh * kw * ci_p)

    def pack_col(v, c_p):   # (C,) -> (C_p, 1) column on sublanes
        return jnp.pad(v, (0, c_p - v.shape[0])).reshape(c_p, 1)

    w_ds = pack_conv(p["w_ds"], cin_p, cout_p)
    w_c1 = pack_conv(p["w_c1"], cout_p, cmid_p)
    w_c2 = pack_conv(p["w_c2"], cmid_p, cout_p)
    b_ds = pack_col(p["b_ds"], cout_p)
    b_c1 = pack_col(p["b_c1"], cmid_p)
    b_c2 = pack_col(p["b_c2"], cout_p)
    g1w = pack_col(p["g1w"], cout_p)
    g1b = pack_col(p["g1b"], cout_p)
    g2w = pack_col(p["g2w"], cmid_p)
    g2b = pack_col(p["g2b"], cmid_p)

    # merged cond weight: rows [0:cout_p) -> scale, [cout_p:2*cout_p) -> shift
    w_scale_t = jnp.pad(p["w_scale"].T, ((0, cout_p - Cout), (0, 0)))
    w_shift_t = jnp.pad(p["w_shift"].T, ((0, cout_p - Cout), (0, 0)))
    w_cond = jnp.concatenate([w_scale_t, w_shift_t], axis=0)  # (2*cout_p, cond_dim)

    w_res = jnp.pad(p["w_res"], ((0, cin_p - Cin), (0, cout_p - Cout))).T  # (cout_p, cin_p)
    b_res = pack_col(p["b_res"], cout_p)

    # tap offsets in padded-flat spatial coords (dy, dx in {-1,0,1})
    offsets = tuple(dy * Wp + dx for dy in (-1, 0, 1) for dx in (-1, 0, 1))

    def full_spec(a):
        nd = a.ndim
        return pl.BlockSpec(a.shape, lambda b, nd=nd: (0,) * nd)

    weights = (w_cond, w_ds, b_ds, g1w, g1b, w_c1, b_c1, g2w, g2b,
               w_c2, b_c2, w_res, b_res)

    grid_spec = pltpu.PrefetchScalarGridSpec(
        num_scalar_prefetch=0,
        grid=(B,),
        in_specs=[
            pl.BlockSpec((1, cin_p, Lp), lambda b: (b, 0, 0)),
            pl.BlockSpec((1, 1, cond_dim), lambda b: (b, 0, 0)),
            full_spec(mask),
        ] + [full_spec(w) for w in weights],
        out_specs=pl.BlockSpec((1, cout_p, Lp), lambda b: (b, 0, 0)),
        scratch_shapes=[pltpu.VMEM((9 * cp_max, Lp), jnp.float32)],
    )

    kernel = functools.partial(
        _cond_block_kernel,
        offsets=offsets, lp=Lp,
        cin_p=cin_p, cout_p=cout_p, cmid_p=cmid_p,
        n_gn1=float(H * W * Cout), n_gn2=float(H * W * Cmid))

    out_pad = pl.pallas_call(
        kernel,
        out_shape=jax.ShapeDtypeStruct((B, cout_p, Lp), jnp.float32),
        grid_spec=grid_spec,
        compiler_params=pltpu.CompilerParams(
            dimension_semantics=("parallel",),
            vmem_limit_bytes=32 * 1024 * 1024),
    )(xp, cond3, mask, *weights)

    # glue: drop padded channels, lane tail, and the spatial halo
    out = out_pad[:, :Cout, :L].reshape(B, Cout, Hp, Wp)[:, :, 1:H + 1, 1:W + 1]
    return out


# -------------------- pure-JAX reference (PyTorch semantics) --------------------
def ref_forward(x_nchw, cond_emb, p):
    x = jnp.transpose(x_nchw, (0, 2, 3, 1))  # NHWC

    def conv3(v, w_hwio, b):
        y = jax.lax.conv_general_dilated(
            v, w_hwio, window_strides=(1, 1), padding="SAME",
            dimension_numbers=("NHWC", "HWIO", "NHWC"))
        return y + b.reshape(1, 1, 1, -1)

    def gn(v, g, bta, eps=1e-5):
        mean = jnp.mean(v, axis=(1, 2, 3), keepdims=True)
        var = jnp.mean((v - mean) ** 2, axis=(1, 2, 3), keepdims=True)
        return ((v - mean) * jax.lax.rsqrt(var + eps)
                * g.reshape(1, 1, 1, -1) + bta.reshape(1, 1, 1, -1))

    gelu = lambda v: 0.5 * v * (1.0 + jax.lax.erf(v * _SQRT2_INV))

    h = conv3(x, p["w_ds"], p["b_ds"])
    scale = gelu(cond_emb @ p["w_scale"])
    shift = gelu(cond_emb @ p["w_shift"])
    h = h * (1.0 + scale[:, None, None, :]) + shift[:, None, None, :]
    h = gn(h, p["g1w"], p["g1b"])
    h = conv3(h, p["w_c1"], p["b_c1"])
    h = gelu(h)
    h = gn(h, p["g2w"], p["g2b"])
    h = conv3(h, p["w_c2"], p["b_c2"])
    res = jnp.einsum("nhwc,cd->nhwd", x, p["w_res"]) + p["b_res"].reshape(1, 1, 1, -1)
    return jnp.transpose(h + res, (0, 3, 1, 2))


if __name__ == "__main__":
    # small shapes implied by the module: in_ch != out_ch so res_conv is a 1x1 conv
    B, Cin, Cout, mult = 2, 4, 8, 1
    H = W = 16
    cond_dim = 32
    Cmid = Cout * mult

    key = jax.random.PRNGKey(0)
    ks = jax.random.split(key, 20)

    def nrm(k, shape, scale):
        return (scale * jax.random.normal(k, shape)).astype(jnp.float32)

    # deterministic synthetic parameters (shapes from the module __init__)
    w_ds = nrm(ks[0], (3, 3, Cin, Cout), 1.0 / math.sqrt(9 * Cin))      # HWIO
    b_ds = nrm(ks[1], (Cout,), 0.05)
    w_scale = nrm(ks[2], (cond_dim, Cout), 1.0 / math.sqrt(cond_dim))   # cond_mlp (split)
    w_shift = nrm(ks[3], (cond_dim, Cout), 1.0 / math.sqrt(cond_dim))
    g1w = (1.0 + nrm(ks[4], (Cout,), 0.1)).astype(jnp.float32)
    g1b = nrm(ks[5], (Cout,), 0.1)
    w_c1 = nrm(ks[6], (3, 3, Cout, Cmid), 1.0 / math.sqrt(9 * Cout))
    b_c1 = nrm(ks[7], (Cmid,), 0.05)
    g2w = (1.0 + nrm(ks[8], (Cmid,), 0.1)).astype(jnp.float32)
    g2b = nrm(ks[9], (Cmid,), 0.1)
    w_c2 = nrm(ks[10], (3, 3, Cmid, Cout), 1.0 / math.sqrt(9 * Cmid))
    b_c2 = nrm(ks[11], (Cout,), 0.05)
    w_res = nrm(ks[12], (Cin, Cout), 1.0 / math.sqrt(Cin))
    b_res = nrm(ks[13], (Cout,), 0.05)

    x = nrm(ks[14], (B, Cin, H, W), 1.0)           # NCHW, like PyTorch
    cond = nrm(ks[15], (B, cond_dim), 1.0)

    params = dict(w_ds=w_ds, b_ds=b_ds, w_scale=w_scale, w_shift=w_shift,
                  g1w=g1w, g1b=g1b, w_c1=w_c1, b_c1=b_c1, g2w=g2w, g2b=g2b,
                  w_c2=w_c2, b_c2=b_c2, w_res=w_res, b_res=b_res)

    out = conditional_block_forward(x, cond, params)
    out = jax.block_until_ready(out)

    ref = ref_forward(x, cond, params)
    np.testing.assert_allclose(np.asarray(out), np.asarray(ref),
                               rtol=1e-3, atol=1e-3)

    print("KERNEL_OK")
</pallas_src>

<mosaic_0001>
module attributes {stable_mosaic.version = 11 : i64} {
  func.func @_cond_block_kernel(%arg0: i32, %arg1: memref<1x8x384xf32, #tpu.memory_space<vmem>>, %arg2: memref<1x1x32xf32, #tpu.memory_space<vmem>>, %arg3: memref<1x384xf32, #tpu.memory_space<vmem>>, %arg4: memref<16x32xf32, #tpu.memory_space<vmem>>, %arg5: memref<8x72xf32, #tpu.memory_space<vmem>>, %arg6: memref<8x1xf32, #tpu.memory_space<vmem>>, %arg7: memref<8x1xf32, #tpu.memory_space<vmem>>, %arg8: memref<8x1xf32, #tpu.memory_space<vmem>>, %arg9: memref<8x72xf32, #tpu.memory_space<vmem>>, %arg10: memref<8x1xf32, #tpu.memory_space<vmem>>, %arg11: memref<8x1xf32, #tpu.memory_space<vmem>>, %arg12: memref<8x1xf32, #tpu.memory_space<vmem>>, %arg13: memref<8x72xf32, #tpu.memory_space<vmem>>, %arg14: memref<8x1xf32, #tpu.memory_space<vmem>>, %arg15: memref<8x8xf32, #tpu.memory_space<vmem>>, %arg16: memref<8x1xf32, #tpu.memory_space<vmem>>, %arg17: memref<1x8x384xf32, #tpu.memory_space<vmem>>, %arg18: memref<72x384xf32, #tpu.memory_space<vmem>>) attributes {dimension_semantics = [#tpu.dimension_semantics<parallel>], iteration_bounds = array<i64: 2>, scalar_prefetch = 0 : i64, scratch_operands = 1 : i64, tpu.core_type = #tpu.core_type<tc>, window_params = [{transform_indices = @transform_0, window_bounds = array<i64: 1, 8, 384>}, {transform_indices = @transform_1, window_bounds = array<i64: 1, 1, 32>}, {pipeline_mode = #tpu.pipeline_mode<synchronous>, transform_indices = @transform_2, window_bounds = array<i64: 1, 384>}, {pipeline_mode = #tpu.pipeline_mode<synchronous>, transform_indices = @transform_3, window_bounds = array<i64: 16, 32>}, {pipeline_mode = #tpu.pipeline_mode<synchronous>, transform_indices = @transform_4, window_bounds = array<i64: 8, 72>}, {pipeline_mode = #tpu.pipeline_mode<synchronous>, transform_indices = @transform_5, window_bounds = array<i64: 8, 1>}, {pipeline_mode = #tpu.pipeline_mode<synchronous>, transform_indices = @transform_6, window_bounds = array<i64: 8, 1>}, {pipeline_mode = #tpu.pipeline_mode<synchronous>, transform_indices = @transform_7, window_bounds = array<i64: 8, 1>}, {pipeline_mode = #tpu.pipeline_mode<synchronous>, transform_indices = @transform_8, window_bounds = array<i64: 8, 72>}, {pipeline_mode = #tpu.pipeline_mode<synchronous>, transform_indices = @transform_9, window_bounds = array<i64: 8, 1>}, {pipeline_mode = #tpu.pipeline_mode<synchronous>, transform_indices = @transform_10, window_bounds = array<i64: 8, 1>}, {pipeline_mode = #tpu.pipeline_mode<synchronous>, transform_indices = @transform_11, window_bounds = array<i64: 8, 1>}, {pipeline_mode = #tpu.pipeline_mode<synchronous>, transform_indices = @transform_12, window_bounds = array<i64: 8, 72>}, {pipeline_mode = #tpu.pipeline_mode<synchronous>, transform_indices = @transform_13, window_bounds = array<i64: 8, 1>}, {pipeline_mode = #tpu.pipeline_mode<synchronous>, transform_indices = @transform_14, window_bounds = array<i64: 8, 8>}, {pipeline_mode = #tpu.pipeline_mode<synchronous>, transform_indices = @transform_15, window_bounds = array<i64: 8, 1>}, {transform_indices = @transform_16, window_bounds = array<i64: 1, 8, 384>}]} {
    %c0 = arith.constant 0 : index
    %c0_0 = arith.constant 0 : index
    %c0_1 = arith.constant 0 : index
    %0 = vector.load %arg1[%c0, %c0_0, %c0_1] : memref<1x8x384xf32, #tpu.memory_space<vmem>>, vector<1x8x384xf32>
    %1 = vector.shape_cast %0 : vector<1x8x384xf32> to vector<8x384xf32>
    %c0_2 = arith.constant 0 : index
    %c0_3 = arith.constant 0 : index
    %2 = vector.load %arg3[%c0_2, %c0_3] : memref<1x384xf32, #tpu.memory_space<vmem>>, vector<1x384xf32>
    %c19_i32 = arith.constant 19 : i32
    %3 = tpu.dynamic_rotate %1 by %c19_i32 dim 1 : vector<8x384xf32>, i32 -> vector<8x384xf32>
    %c0_4 = arith.constant 0 : index
    %c0_5 = arith.constant 0 : index
    %4 = vector.load %arg18[%c0_4, %c0_5] : memref<72x384xf32, #tpu.memory_space<vmem>>, vector<8x384xf32>
    tpu.vector_store %arg18[%c0_4, %c0_5], %3 {strides = array<i32>} : memref<72x384xf32, #tpu.memory_space<vmem>>, vector<8x384xf32>,
    %c18_i32 = arith.constant 18 : i32
    %5 = tpu.dynamic_rotate %1 by %c18_i32 dim 1 : vector<8x384xf32>, i32 -> vector<8x384xf32>
    %c8 = arith.constant 8 : index
    %c0_6 = arith.constant 0 : index
    %6 = vector.load %arg18[%c8, %c0_6] : memref<72x384xf32, #tpu.memory_space<vmem>>, vector<8x384xf32>
    tpu.vector_store %arg18[%c8, %c0_6], %5 {strides = array<i32>} : memref<72x384xf32, #tpu.memory_space<vmem>>, vector<8x384xf32>,
    %c17_i32 = arith.constant 17 : i32
    %7 = tpu.dynamic_rotate %1 by %c17_i32 dim 1 : vector<8x384xf32>, i32 -> vector<8x384xf32>
    %c16 = arith.constant 16 : index
    %c0_7 = arith.constant 0 : index
    %8 = vector.load %arg18[%c16, %c0_7] : memref<72x384xf32, #tpu.memory_space<vmem>>, vector<8x384xf32>
    tpu.vector_store %arg18[%c16, %c0_7], %7 {strides = array<i32>} : memref<72x384xf32, #tpu.memory_space<vmem>>, vector<8x384xf32>,
    %c1_i32 = arith.constant 1 : i32
    %9 = tpu.dynamic_rotate %1 by %c1_i32 dim 1 : vector<8x384xf32>, i32 -> vector<8x384xf32>
    %c24 = arith.constant 24 : index
    %c0_8 = arith.constant 0 : index
    %10 = vector.load %arg18[%c24, %c0_8] : memref<72x384xf32, #tpu.memory_space<vmem>>, vector<8x384xf32>
    tpu.vector_store %arg18[%c24, %c0_8], %9 {strides = array<i32>} : memref<72x384xf32, #tpu.memory_space<vmem>>, vector<8x384xf32>,
    %c32 = arith.constant 32 : index
    %c0_9 = arith.constant 0 : index
    %11 = vector.load %arg18[%c32, %c0_9] : memref<72x384xf32, #tpu.memory_space<vmem>>, vector<8x384xf32>
    tpu.vector_store %arg18[%c32, %c0_9], %1 {strides = array<i32>} : memref<72x384xf32, #tpu.memory_space<vmem>>, vector<8x384xf32>,
    %c383_i32 = arith.constant 383 : i32
    %12 = tpu.dynamic_rotate %1 by %c383_i32 dim 1 : vector<8x384xf32>, i32 -> vector<8x384xf32>
    %c40 = arith.constant 40 : index
    %c0_10 = arith.constant 0 : index
    %13 = vector.load %arg18[%c40, %c0_10] : memref<72x384xf32, #tpu.memory_space<vmem>>, vector<8x384xf32>
    tpu.vector_store %arg18[%c40, %c0_10], %12 {strides = array<i32>} : memref<72x384xf32, #tpu.memory_space<vmem>>, vector<8x384xf32>,
    %c367_i32 = arith.constant 367 : i32
    %14 = tpu.dynamic_rotate %1 by %c367_i32 dim 1 : vector<8x384xf32>, i32 -> vector<8x384xf32>
    %c48 = arith.constant 48 : index
    %c0_11 = arith.constant 0 : index
    %15 = vector.load %arg18[%c48, %c0_11] : memref<72x384xf32, #tpu.memory_space<vmem>>, vector<8x384xf32>
    tpu.vector_store %arg18[%c48, %c0_11], %14 {strides = array<i32>} : memref<72x384xf32, #tpu.memory_space<vmem>>, vector<8x384xf32>,
    %c366_i32 = arith.constant 366 : i32
    %16 = tpu.dynamic_rotate %1 by %c366_i32 dim 1 : vector<8x384xf32>, i32 -> vector<8x384xf32>
    %c56 = arith.constant 56 : index
    %c0_12 = arith.constant 0 : index
    %17 = vector.load %arg18[%c56, %c0_12] : memref<72x384xf32, #tpu.memory_space<vmem>>, vector<8x384xf32>
    tpu.vector_store %arg18[%c56, %c0_12], %16 {strides = array<i32>} : memref<72x384xf32, #tpu.memory_space<vmem>>, vector<8x384xf32>,
    %c365_i32 = arith.constant 365 : i32
    %18 = tpu.dynamic_rotate %1 by %c365_i32 dim 1 : vector<8x384xf32>, i32 -> vector<8x384xf32>
    %c64 = arith.constant 64 : index
    %c0_13 = arith.constant 0 : index
    %19 = vector.load %arg18[%c64, %c0_13] : memref<72x384xf32, #tpu.memory_space<vmem>>, vector<8x384xf32>
    tpu.vector_store %arg18[%c64, %c0_13], %18 {strides = array<i32>} : memref<72x384xf32, #tpu.memory_space<vmem>>, vector<8x384xf32>,
    %c0_14 = arith.constant 0 : index
    %c0_15 = arith.constant 0 : index
    %20 = vector.load %arg18[%c0_14, %c0_15] : memref<72x384xf32, #tpu.memory_space<vmem>>, vector<72x384xf32>
    %c0_16 = arith.constant 0 : index
    %c0_17 = arith.constant 0 : index
    %21 = vector.load %arg5[%c0_16, %c0_17] : memref<8x72xf32, #tpu.memory_space<vmem>>, vector<8x72xf32>
    %cst = arith.constant dense<0.000000e+00> : vector<8x384xf32>
    %22 = tpu.matmul %21, %20, %cst {dimension_numbers = #tpu.dot_dimension_numbers<[1], [0], [0], [1], [0, 0, 1, 1], [], []>} : vector<8x72xf32>, vector<72x384xf32>, vector<8x384xf32> -> vector<8x384xf32>
    %c0_18 = arith.constant 0 : index
    %c0_19 = arith.constant 0 : index
    %23 = vector.load %arg6[%c0_18, %c0_19] : memref<8x1xf32, #tpu.memory_space<vmem>>, vector<8x1xf32>
    %24 = vector.broadcast %23 : vector<8x1xf32> to vector<8x384xf32>
    %25 = arith.addf %22, %24 : vector<8x384xf32>
    %c0_20 = arith.constant 0 : index
    %c0_21 = arith.constant 0 : index
    %26 = vector.load %arg4[%c0_20, %c0_21] : memref<16x32xf32, #tpu.memory_space<vmem>>, vector<16x32xf32>
    %c0_22 = arith.constant 0 : index
    %c0_23 = arith.constant 0 : index
    %c0_24 = arith.constant 0 : index
    %27 = vector.load %arg2[%c0_22, %c0_23, %c0_24] : memref<1x1x32xf32, #tpu.memory_space<vmem>>, vector<1x1x32xf32>
    %28 = vector.shape_cast %27 : vector<1x1x32xf32> to vector<1x32xf32>
    %29 = vector.broadcast %28 : vector<1x32xf32> to vector<16x32xf32>
    %30 = arith.mulf %26, %29 : vector<16x32xf32>
    %cst_25 = arith.constant dense<0.000000e+00> : vector<16xf32>
    %31 = vector.multi_reduction <add>, %30, %cst_25 [1] : vector<16x32xf32> to vector<16xf32>
    %32 = vector.shape_cast %31 : vector<16xf32> to vector<16x1xf32>
    %cst_26 = arith.constant 5.000000e-01 : f32
    %33 = vector.broadcast %cst_26 : f32 to vector<16x1xf32>
    %34 = arith.mulf %33, %32 : vector<16x1xf32>
    %cst_27 = arith.constant 0.707106769 : f32
    %35 = vector.broadcast %cst_27 : f32 to vector<16x1xf32>
    %36 = arith.mulf %32, %35 : vector<16x1xf32>
    %37 = math.erf %36 : vector<16x1xf32>
    %cst_28 = arith.constant 1.000000e+00 : f32
    %38 = vector.broadcast %cst_28 : f32 to vector<16x1xf32>
    %39 = arith.addf %38, %37 : vector<16x1xf32>
    %40 = arith.mulf %34, %39 : vector<16x1xf32>
    %41 = vector.extract_strided_slice %40 {offsets = [0, 0], sizes = [8, 1], strides = [1, 1]} : vector<16x1xf32> to vector<8x1xf32>
    %42 = vector.extract_strided_slice %40 {offsets = [8, 0], sizes = [8, 1], strides = [1, 1]} : vector<16x1xf32> to vector<8x1xf32>
    %cst_29 = arith.constant 1.000000e+00 : f32
    %43 = vector.broadcast %cst_29 : f32 to vector<8x1xf32>
    %44 = arith.addf %43, %41 : vector<8x1xf32>
    %45 = vector.broadcast %44 : vector<8x1xf32> to vector<8x384xf32>
    %46 = arith.mulf %25, %45 : vector<8x384xf32>
    %47 = vector.broadcast %42 : vector<8x1xf32> to vector<8x384xf32>
    %48 = arith.addf %46, %47 : vector<8x384xf32>
    %49 = vector.broadcast %2 : vector<1x384xf32> to vector<8x384xf32>
    %50 = arith.mulf %48, %49 : vector<8x384xf32>
    %51 = vector.shape_cast %50 : vector<8x384xf32> to vector<1x8x384xf32>
    %cst_30 = arith.constant dense<0.000000e+00> : vector<1xf32>
    %52 = vector.multi_reduction <add>, %51, %cst_30 [1, 2] : vector<1x8x384xf32> to vector<1xf32>
    %53 = vector.shape_cast %52 : vector<1xf32> to vector<1x1x1xf32>
    %54 = vector.extract %53[0, 0, 0] : f32 from vector<1x1x1xf32>
    %55 = arith.mulf %50, %50 : vector<8x384xf32>
    %56 = vector.shape_cast %55 : vector<8x384xf32> to vector<1x8x384xf32>
    %cst_31 = arith.constant dense<0.000000e+00> : vector<1xf32>
    %57 = vector.multi_reduction <add>, %56, %cst_31 [1, 2] : vector<1x8x384xf32> to vector<1xf32>
    %58 = vector.shape_cast %57 : vector<1xf32> to vector<1x1x1xf32>
    %59 = vector.extract %58[0, 0, 0] : f32 from vector<1x1x1xf32>
    %cst_32 = arith.constant 4.8828125E-4 : f32
    %60 = arith.mulf %54, %cst_32 : f32
    %cst_33 = arith.constant 4.8828125E-4 : f32
    %61 = arith.mulf %59, %cst_33 : f32
    %62 = arith.mulf %60, %60 : f32
    %63 = arith.subf %61, %62 : f32
    %cst_34 = arith.constant 9.99999974E-6 : f32
    %64 = arith.addf %63, %cst_34 : f32
    %65 = math.rsqrt %64 : f32
    %66 = vector.broadcast %60 : f32 to vector<8x384xf32>
    %67 = arith.subf %50, %66 : vector<8x384xf32>
    %68 = vector.broadcast %65 : f32 to vector<8x384xf32>
    %69 = arith.mulf %67, %68 : vector<8x384xf32>
    %c0_35 = arith.constant 0 : index
    %c0_36 = arith.constant 0 : index
    %70 = vector.load %arg7[%c0_35, %c0_36] : memref<8x1xf32, #tpu.memory_space<vmem>>, vector<8x1xf32>
    %71 = vector.broadcast %70 : vector<8x1xf32> to vector<8x384xf32>
    %72 = arith.mulf %69, %71 : vector<8x384xf32>
    %c0_37 = arith.constant 0 : index
    %c0_38 = arith.constant 0 : index
    %73 = vector.load %arg8[%c0_37, %c0_38] : memref<8x1xf32, #tpu.memory_space<vmem>>, vector<8x1xf32>
    %74 = vector.broadcast %73 : vector<8x1xf32> to vector<8x384xf32>
    %75 = arith.addf %72, %74 : vector<8x384xf32>
    %76 = vector.broadcast %2 : vector<1x384xf32> to vector<8x384xf32>
    %77 = arith.mulf %75, %76 : vector<8x384xf32>
    %c19_i32_39 = arith.constant 19 : i32
    %78 = tpu.dynamic_rotate %77 by %c19_i32_39 dim 1 : vector<8x384xf32>, i32 -> vector<8x384xf32>
    %c0_40 = arith.constant 0 : index
    %c0_41 = arith.constant 0 : index
    %79 = vector.load %arg18[%c0_40, %c0_41] : memref<72x384xf32, #tpu.memory_space<vmem>>, vector<8x384xf32>
    tpu.vector_store %arg18[%c0_40, %c0_41], %78 {strides = array<i32>} : memref<72x384xf32, #tpu.memory_space<vmem>>, vector<8x384xf32>,
    %c18_i32_42 = arith.constant 18 : i32
    %80 = tpu.dynamic_rotate %77 by %c18_i32_42 dim 1 : vector<8x384xf32>, i32 -> vector<8x384xf32>
    %c8_43 = arith.constant 8 : index
    %c0_44 = arith.constant 0 : index
    %81 = vector.load %arg18[%c8_43, %c0_44] : memref<72x384xf32, #tpu.memory_space<vmem>>, vector<8x384xf32>
    tpu.vector_store %arg18[%c8_43, %c0_44], %80 {strides = array<i32>} : memref<72x384xf32, #tpu.memory_space<vmem>>, vector<8x384xf32>,
    %c17_i32_45 = arith.constant 17 : i32
    %82 = tpu.dynamic_rotate %77 by %c17_i32_45 dim 1 : vector<8x384xf32>, i32 -> vector<8x384xf32>
    %c16_46 = arith.constant 16 : index
    %c0_47 = arith.constant 0 : index
    %83 = vector.load %arg18[%c16_46, %c0_47] : memref<72x384xf32, #tpu.memory_space<vmem>>, vector<8x384xf32>
    tpu.vector_store %arg18[%c16_46, %c0_47], %82 {strides = array<i32>} : memref<72x384xf32, #tpu.memory_space<vmem>>, vector<8x384xf32>,
    %c1_i32_48 = arith.constant 1 : i32
    %84 = tpu.dynamic_rotate %77 by %c1_i32_48 dim 1 : vector<8x384xf32>, i32 -> vector<8x384xf32>
    %c24_49 = arith.constant 24 : index
    %c0_50 = arith.constant 0 : index
    %85 = vector.load %arg18[%c24_49, %c0_50] : memref<72x384xf32, #tpu.memory_space<vmem>>, vector<8x384xf32>
    tpu.vector_store %arg18[%c24_49, %c0_50], %84 {strides = array<i32>} : memref<72x384xf32, #tpu.memory_space<vmem>>, vector<8x384xf32>,
    %c32_51 = arith.constant 32 : index
    %c0_52 = arith.constant 0 : index
    %86 = vector.load %arg18[%c32_51, %c0_52] : memref<72x384xf32, #tpu.memory_space<vmem>>, vector<8x384xf32>
    tpu.vector_store %arg18[%c32_51, %c0_52], %77 {strides = array<i32>} : memref<72x384xf32, #tpu.memory_space<vmem>>, vector<8x384xf32>,
    %c383_i32_53 = arith.constant 383 : i32
    %87 = tpu.dynamic_rotate %77 by %c383_i32_53 dim 1 : vector<8x384xf32>, i32 -> vector<8x384xf32>
    %c40_54 = arith.constant 40 : index
    %c0_55 = arith.constant 0 : index
    %88 = vector.load %arg18[%c40_54, %c0_55] : memref<72x384xf32, #tpu.memory_space<vmem>>, vector<8x384xf32>
    tpu.vector_store %arg18[%c40_54, %c0_55], %87 {strides = array<i32>} : memref<72x384xf32, #tpu.memory_space<vmem>>, vector<8x384xf32>,
    %c367_i32_56 = arith.constant 367 : i32
    %89 = tpu.dynamic_rotate %77 by %c367_i32_56 dim 1 : vector<8x384xf32>, i32 -> vector<8x384xf32>
    %c48_57 = arith.constant 48 : index
    %c0_58 = arith.constant 0 : index
    %90 = vector.load %arg18[%c48_57, %c0_58] : memref<72x384xf32, #tpu.memory_space<vmem>>, vector<8x384xf32>
    tpu.vector_store %arg18[%c48_57, %c0_58], %89 {strides = array<i32>} : memref<72x384xf32, #tpu.memory_space<vmem>>, vector<8x384xf32>,
    %c366_i32_59 = arith.constant 366 : i32
    %91 = tpu.dynamic_rotate %77 by %c366_i32_59 dim 1 : vector<8x384xf32>, i32 -> vector<8x384xf32>
    %c56_60 = arith.constant 56 : index
    %c0_61 = arith.constant 0 : index
    %92 = vector.load %arg18[%c56_60, %c0_61] : memref<72x384xf32, #tpu.memory_space<vmem>>, vector<8x384xf32>
    tpu.vector_store %arg18[%c56_60, %c0_61], %91 {strides = array<i32>} : memref<72x384xf32, #tpu.memory_space<vmem>>, vector<8x384xf32>,
    %c365_i32_62 = arith.constant 365 : i32
    %93 = tpu.dynamic_rotate %77 by %c365_i32_62 dim 1 : vector<8x384xf32>, i32 -> vector<8x384xf32>
    %c64_63 = arith.constant 64 : index
    %c0_64 = arith.constant 0 : index
    %94 = vector.load %arg18[%c64_63, %c0_64] : memref<72x384xf32, #tpu.memory_space<vmem>>, vector<8x384xf32>
    tpu.vector_store %arg18[%c64_63, %c0_64], %93 {strides = array<i32>} : memref<72x384xf32, #tpu.memory_space<vmem>>, vector<8x384xf32>,
    %c0_65 = arith.constant 0 : index
    %c0_66 = arith.constant 0 : index
    %95 = vector.load %arg18[%c0_65, %c0_66] : memref<72x384xf32, #tpu.memory_space<vmem>>, vector<72x384xf32>
    %c0_67 = arith.constant 0 : index
    %c0_68 = arith.constant 0 : index
    %96 = vector.load %arg9[%c0_67, %c0_68] : memref<8x72xf32, #tpu.memory_space<vmem>>, vector<8x72xf32>
    %cst_69 = arith.constant dense<0.000000e+00> : vector<8x384xf32>
    %97 = tpu.matmul %96, %95, %cst_69 {dimension_numbers = #tpu.dot_dimension_numbers<[1], [0], [0], [1], [0, 0, 1, 1], [], []>} : vector<8x72xf32>, vector<72x384xf32>, vector<8x384xf32> -> vector<8x384xf32>
    %c0_70 = arith.constant 0 : index
    %c0_71 = arith.constant 0 : index
    %98 = vector.load %arg10[%c0_70, %c0_71] : memref<8x1xf32, #tpu.memory_space<vmem>>, vector<8x1xf32>
    %99 = vector.broadcast %98 : vector<8x1xf32> to vector<8x384xf32>
    %100 = arith.addf %97, %99 : vector<8x384xf32>
    %cst_72 = arith.constant 5.000000e-01 : f32
    %101 = vector.broadcast %cst_72 : f32 to vector<8x384xf32>
    %102 = arith.mulf %101, %100 : vector<8x384xf32>
    %cst_73 = arith.constant 0.707106769 : f32
    %103 = vector.broadcast %cst_73 : f32 to vector<8x384xf32>
    %104 = arith.mulf %100, %103 : vector<8x384xf32>
    %105 = math.erf %104 : vector<8x384xf32>
    %cst_74 = arith.constant 1.000000e+00 : f32
    %106 = vector.broadcast %cst_74 : f32 to vector<8x384xf32>
    %107 = arith.addf %106, %105 : vector<8x384xf32>
    %108 = arith.mulf %102, %107 : vector<8x384xf32>
    %109 = vector.broadcast %2 : vector<1x384xf32> to vector<8x384xf32>
    %110 = arith.mulf %108, %109 : vector<8x384xf32>
    %111 = vector.shape_cast %110 : vector<8x384xf32> to vector<1x8x384xf32>
    %cst_75 = arith.constant dense<0.000000e+00> : vector<1xf32>
    %112 = vector.multi_reduction <add>, %111, %cst_75 [1, 2] : vector<1x8x384xf32> to vector<1xf32>
    %113 = vector.shape_cast %112 : vector<1xf32> to vector<1x1x1xf32>
    %114 = vector.extract %113[0, 0, 0] : f32 from vector<1x1x1xf32>
    %115 = arith.mulf %110, %110 : vector<8x384xf32>
    %116 = vector.shape_cast %115 : vector<8x384xf32> to vector<1x8x384xf32>
    %cst_76 = arith.constant dense<0.000000e+00> : vector<1xf32>
    %117 = vector.multi_reduction <add>, %116, %cst_76 [1, 2] : vector<1x8x384xf32> to vector<1xf32>
    %118 = vector.shape_cast %117 : vector<1xf32> to vector<1x1x1xf32>
    %119 = vector.extract %118[0, 0, 0] : f32 from vector<1x1x1xf32>
    %cst_77 = arith.constant 4.8828125E-4 : f32
    %120 = arith.mulf %114, %cst_77 : f32
    %cst_78 = arith.constant 4.8828125E-4 : f32
    %121 = arith.mulf %119, %cst_78 : f32
    %122 = arith.mulf %120, %120 : f32
    %123 = arith.subf %121, %122 : f32
    %cst_79 = arith.constant 9.99999974E-6 : f32
    %124 = arith.addf %123, %cst_79 : f32
    %125 = math.rsqrt %124 : f32
    %126 = vector.broadcast %120 : f32 to vector<8x384xf32>
    %127 = arith.subf %110, %126 : vector<8x384xf32>
    %128 = vector.broadcast %125 : f32 to vector<8x384xf32>
    %129 = arith.mulf %127, %128 : vector<8x384xf32>
    %c0_80 = arith.constant 0 : index
    %c0_81 = arith.constant 0 : index
    %130 = vector.load %arg11[%c0_80, %c0_81] : memref<8x1xf32, #tpu.memory_space<vmem>>, vector<8x1xf32>
    %131 = vector.broadcast %130 : vector<8x1xf32> to vector<8x384xf32>
    %132 = arith.mulf %129, %131 : vector<8x384xf32>
    %c0_82 = arith.constant 0 : index
    %c0_83 = arith.constant 0 : index
    %133 = vector.load %arg12[%c0_82, %c0_83] : memref<8x1xf32, #tpu.memory_space<vmem>>, vector<8x1xf32>
    %134 = vector.broadcast %133 : vector<8x1xf32> to vector<8x384xf32>
    %135 = arith.addf %132, %134 : vector<8x384xf32>
    %136 = vector.broadcast %2 : vector<1x384xf32> to vector<8x384xf32>
    %137 = arith.mulf %135, %136 : vector<8x384xf32>
    %c19_i32_84 = arith.constant 19 : i32
    %138 = tpu.dynamic_rotate %137 by %c19_i32_84 dim 1 : vector<8x384xf32>, i32 -> vector<8x384xf32>
    %c0_85 = arith.constant 0 : index
    %c0_86 = arith.constant 0 : index
    %139 = vector.load %arg18[%c0_85, %c0_86] : memref<72x384xf32, #tpu.memory_space<vmem>>, vector<8x384xf32>
    tpu.vector_store %arg18[%c0_85, %c0_86], %138 {strides = array<i32>} : memref<72x384xf32, #tpu.memory_space<vmem>>, vector<8x384xf32>,
    %c18_i32_87 = arith.constant 18 : i32
    %140 = tpu.dynamic_rotate %137 by %c18_i32_87 dim 1 : vector<8x384xf32>, i32 -> vector<8x384xf32>
    %c8_88 = arith.constant 8 : index
    %c0_89 = arith.constant 0 : index
    %141 = vector.load %arg18[%c8_88, %c0_89] : memref<72x384xf32, #tpu.memory_space<vmem>>, vector<8x384xf32>
    tpu.vector_store %arg18[%c8_88, %c0_89], %140 {strides = array<i32>} : memref<72x384xf32, #tpu.memory_space<vmem>>, vector<8x384xf32>,
    %c17_i32_90 = arith.constant 17 : i32
    %142 = tpu.dynamic_rotate %137 by %c17_i32_90 dim 1 : vector<8x384xf32>, i32 -> vector<8x384xf32>
    %c16_91 = arith.constant 16 : index
    %c0_92 = arith.constant 0 : index
    %143 = vector.load %arg18[%c16_91, %c0_92] : memref<72x384xf32, #tpu.memory_space<vmem>>, vector<8x384xf32>
    tpu.vector_store %arg18[%c16_91, %c0_92], %142 {strides = array<i32>} : memref<72x384xf32, #tpu.memory_space<vmem>>, vector<8x384xf32>,
    %c1_i32_93 = arith.constant 1 : i32
    %144 = tpu.dynamic_rotate %137 by %c1_i32_93 dim 1 : vector<8x384xf32>, i32 -> vector<8x384xf32>
    %c24_94 = arith.constant 24 : index
    %c0_95 = arith.constant 0 : index
    %145 = vector.load %arg18[%c24_94, %c0_95] : memref<72x384xf32, #tpu.memory_space<vmem>>, vector<8x384xf32>
    tpu.vector_store %arg18[%c24_94, %c0_95], %144 {strides = array<i32>} : memref<72x384xf32, #tpu.memory_space<vmem>>, vector<8x384xf32>,
    %c32_96 = arith.constant 32 : index
    %c0_97 = arith.constant 0 : index
    %146 = vector.load %arg18[%c32_96, %c0_97] : memref<72x384xf32, #tpu.memory_space<vmem>>, vector<8x384xf32>
    tpu.vector_store %arg18[%c32_96, %c0_97], %137 {strides = array<i32>} : memref<72x384xf32, #tpu.memory_space<vmem>>, vector<8x384xf32>,
    %c383_i32_98 = arith.constant 383 : i32
    %147 = tpu.dynamic_rotate %137 by %c383_i32_98 dim 1 : vector<8x384xf32>, i32 -> vector<8x384xf32>
    %c40_99 = arith.constant 40 : index
    %c0_100 = arith.constant 0 : index
    %148 = vector.load %arg18[%c40_99, %c0_100] : memref<72x384xf32, #tpu.memory_space<vmem>>, vector<8x384xf32>
    tpu.vector_store %arg18[%c40_99, %c0_100], %147 {strides = array<i32>} : memref<72x384xf32, #tpu.memory_space<vmem>>, vector<8x384xf32>,
    %c367_i32_101 = arith.constant 367 : i32
    %149 = tpu.dynamic_rotate %137 by %c367_i32_101 dim 1 : vector<8x384xf32>, i32 -> vector<8x384xf32>
    %c48_102 = arith.constant 48 : index
    %c0_103 = arith.constant 0 : index
    %150 = vector.load %arg18[%c48_102, %c0_103] : memref<72x384xf32, #tpu.memory_space<vmem>>, vector<8x384xf32>
    tpu.vector_store %arg18[%c48_102, %c0_103], %149 {strides = array<i32>} : memref<72x384xf32, #tpu.memory_space<vmem>>, vector<8x384xf32>,
    %c366_i32_104 = arith.constant 366 : i32
    %151 = tpu.dynamic_rotate %137 by %c366_i32_104 dim 1 : vector<8x384xf32>, i32 -> vector<8x384xf32>
    %c56_105 = arith.constant 56 : index
    %c0_106 = arith.constant 0 : index
    %152 = vector.load %arg18[%c56_105, %c0_106] : memref<72x384xf32, #tpu.memory_space<vmem>>, vector<8x384xf32>
    tpu.vector_store %arg18[%c56_105, %c0_106], %151 {strides = array<i32>} : memref<72x384xf32, #tpu.memory_space<vmem>>, vector<8x384xf32>,
    %c365_i32_107 = arith.constant 365 : i32
    %153 = tpu.dynamic_rotate %137 by %c365_i32_107 dim 1 : vector<8x384xf32>, i32 -> vector<8x384xf32>
    %c64_108 = arith.constant 64 : index
    %c0_109 = arith.constant 0 : index
    %154 = vector.load %arg18[%c64_108, %c0_109] : memref<72x384xf32, #tpu.memory_space<vmem>>, vector<8x384xf32>
    tpu.vector_store %arg18[%c64_108, %c0_109], %153 {strides = array<i32>} : memref<72x384xf32, #tpu.memory_space<vmem>>, vector<8x384xf32>,
    %c0_110 = arith.constant 0 : index
    %c0_111 = arith.constant 0 : index
    %155 = vector.load %arg18[%c0_110, %c0_111] : memref<72x384xf32, #tpu.memory_space<vmem>>, vector<72x384xf32>
    %c0_112 = arith.constant 0 : index
    %c0_113 = arith.constant 0 : index
    %156 = vector.load %arg13[%c0_112, %c0_113] : memref<8x72xf32, #tpu.memory_space<vmem>>, vector<8x72xf32>
    %cst_114 = arith.constant dense<0.000000e+00> : vector<8x384xf32>
    %157 = tpu.matmul %156, %155, %cst_114 {dimension_numbers = #tpu.dot_dimension_numbers<[1], [0], [0], [1], [0, 0, 1, 1], [], []>} : vector<8x72xf32>, vector<72x384xf32>, vector<8x384xf32> -> vector<8x384xf32>
    %c0_115 = arith.constant 0 : index
    %c0_116 = arith.constant 0 : index
    %158 = vector.load %arg14[%c0_115, %c0_116] : memref<8x1xf32, #tpu.memory_space<vmem>>, vector<8x1xf32>
    %159 = vector.broadcast %158 : vector<8x1xf32> to vector<8x384xf32>
    %160 = arith.addf %157, %159 : vector<8x384xf32>
    %c0_117 = arith.constant 0 : index
    %c0_118 = arith.constant 0 : index
    %161 = vector.load %arg15[%c0_117, %c0_118] : memref<8x8xf32, #tpu.memory_space<vmem>>, vector<8x8xf32>
    %cst_119 = arith.constant dense<0.000000e+00> : vector<8x384xf32>
    %162 = tpu.matmul %161, %1, %cst_119 {dimension_numbers = #tpu.dot_dimension_numbers<[1], [0], [0], [1], [0, 0, 1, 1], [], []>} : vector<8x8xf32>, vector<8x384xf32>, vector<8x384xf32> -> vector<8x384xf32>
    %c0_120 = arith.constant 0 : index
    %c0_121 = arith.constant 0 : index
    %163 = vector.load %arg16[%c0_120, %c0_121] : memref<8x1xf32, #tpu.memory_space<vmem>>, vector<8x1xf32>
    %164 = vector.broadcast %163 : vector<8x1xf32> to vector<8x384xf32>
    %165 = arith.addf %162, %164 : vector<8x384xf32>
    %166 = arith.addf %160, %165 : vector<8x384xf32>
    %c0_122 = arith.constant 0 : index
    %c0_123 = arith.constant 0 : index
    %c0_124 = arith.constant 0 : index
    %167 = vector.load %arg17[%c0_122, %c0_123, %c0_124] : memref<1x8x384xf32, #tpu.memory_space<vmem>>, vector<1x8x384xf32>
    %168 = vector.shape_cast %167 : vector<1x8x384xf32> to vector<8x384xf32>
    %169 = vector.shape_cast %166 : vector<8x384xf32> to vector<1x8x384xf32>
    tpu.vector_store %arg17[%c0_122, %c0_123, %c0_124], %169 {strides = array<i32>} : memref<1x8x384xf32, #tpu.memory_space<vmem>>, vector<1x8x384xf32>,
    return
  }
  func.func @transform_0(%arg0: i32) -> (i32, i32, i32) {
    %c0_i32 = arith.constant 0 : i32
    %c0_i32_0 = arith.constant 0 : i32
    %c0_i32_1 = arith.constant 0 : i32
    return %arg0, %c0_i32, %c0_i32_0 : i32, i32, i32
  }
  func.func @transform_1(%arg0: i32) -> (i32, i32, i32) {
    %c0_i32 = arith.constant 0 : i32
    %c0_i32_0 = arith.constant 0 : i32
    %c0_i32_1 = arith.constant 0 : i32
    return %arg0, %c0_i32, %c0_i32_0 : i32, i32, i32
  }
  func.func @transform_2(%arg0: i32) -> (i32, i32) {
    %c0_i32 = arith.constant 0 : i32
    %c0_i32_0 = arith.constant 0 : i32
    %c0_i32_1 = arith.constant 0 : i32
    return %c0_i32, %c0_i32_0 : i32, i32
  }
  func.func @transform_3(%arg0: i32) -> (i32, i32) {
    %c0_i32 = arith.constant 0 : i32
    %c0_i32_0 = arith.constant 0 : i32
    %c0_i32_1 = arith.constant 0 : i32
    return %c0_i32, %c0_i32_0 : i32, i32
  }
  func.func @transform_4(%arg0: i32) -> (i32, i32) {
    %c0_i32 = arith.constant 0 : i32
    %c0_i32_0 = arith.constant 0 : i32
    %c0_i32_1 = arith.constant 0 : i32
    return %c0_i32, %c0_i32_0 : i32, i32
  }
  func.func @transform_5(%arg0: i32) -> (i32, i32) {
    %c0_i32 = arith.constant 0 : i32
    %c0_i32_0 = arith.constant 0 : i32
    %c0_i32_1 = arith.constant 0 : i32
    return %c0_i32, %c0_i32_0 : i32, i32
  }
  func.func @transform_6(%arg0: i32) -> (i32, i32) {
    %c0_i32 = arith.constant 0 : i32
    %c0_i32_0 = arith.constant 0 : i32
    %c0_i32_1 = arith.constant 0 : i32
    return %c0_i32, %c0_i32_0 : i32, i32
  }
  func.func @transform_7(%arg0: i32) -> (i32, i32) {
    %c0_i32 = arith.constant 0 : i32
    %c0_i32_0 = arith.constant 0 : i32
    %c0_i32_1 = arith.constant 0 : i32
    return %c0_i32, %c0_i32_0 : i32, i32
  }
  func.func @transform_8(%arg0: i32) -> (i32, i32) {
    %c0_i32 = arith.constant 0 : i32
    %c0_i32_0 = arith.constant 0 : i32
    %c0_i32_1 = arith.constant 0 : i32
    return %c0_i32, %c0_i32_0 : i32, i32
  }
  func.func @transform_9(%arg0: i32) -> (i32, i32) {
    %c0_i32 = arith.constant 0 : i32
    %c0_i32_0 = arith.constant 0 : i32
    %c0_i32_1 = arith.constant 0 : i32
    return %c0_i32, %c0_i32_0 : i32, i32
  }
  func.func @transform_10(%arg0: i32) -> (i32, i32) {
    %c0_i32 = arith.constant 0 : i32
    %c0_i32_0 = arith.constant 0 : i32
    %c0_i32_1 = arith.constant 0 : i32
    return %c0_i32, %c0_i32_0 : i32, i32
  }
  func.func @transform_11(%arg0: i32) -> (i32, i32) {
    %c0_i32 = arith.constant 0 : i32
    %c0_i32_0 = arith.constant 0 : i32
    %c0_i32_1 = arith.constant 0 : i32
    return %c0_i32, %c0_i32_0 : i32, i32
  }
  func.func @transform_12(%arg0: i32) -> (i32, i32) {
    %c0_i32 = arith.constant 0 : i32
    %c0_i32_0 = arith.constant 0 : i32
    %c0_i32_1 = arith.constant 0 : i32
    return %c0_i32, %c0_i32_0 : i32, i32
  }
  func.func @transform_13(%arg0: i32) -> (i32, i32) {
    %c0_i32 = arith.constant 0 : i32
    %c0_i32_0 = arith.constant 0 : i32
    %c0_i32_1 = arith.constant 0 : i32
    return %c0_i32, %c0_i32_0 : i32, i32
  }
  func.func @transform_14(%arg0: i32) -> (i32, i32) {
    %c0_i32 = arith.constant 0 : i32
    %c0_i32_0 = arith.constant 0 : i32
    %c0_i32_1 = arith.constant 0 : i32
    return %c0_i32, %c0_i32_0 : i32, i32
  }
  func.func @transform_15(%arg0: i32) -> (i32, i32) {
    %c0_i32 = arith.constant 0 : i32
    %c0_i32_0 = arith.constant 0 : i32
    %c0_i32_1 = arith.constant 0 : i32
    return %c0_i32, %c0_i32_0 : i32, i32
  }
  func.func @transform_16(%arg0: i32) -> (i32, i32, i32) {
    %c0_i32 = arith.constant 0 : i32
    %c0_i32_0 = arith.constant 0 : i32
    %c0_i32_1 = arith.constant 0 : i32
    return %arg0, %c0_i32, %c0_i32_0 : i32, i32, i32
  }
}

</mosaic_0001>

<bundles_post_ra>
// kernel: tpu_custom_call.1
= control target key start
LH: loop header
LB: loop body
LE: loop exit
PB: predicated region body
PF: predicated region fallthrough
CT: control target
= control target key end

     0   :  { %s2931_s0 = inlined_call_operand.vmem [shape: f32[2,8,384], index: 0, kind: input, shape index: {}]   ;;  %s2932_s1 = inlined_call_operand.hbm [shape: f32[2,1,32], index: 1, kind: input, shape index: {}]   ;;  %s2933_s2 = inlined_call_operand.hbm [shape: f32[1,384], index: 2, kind: input, shape index: {}]   ;;  %s2934_s3 = inlined_call_operand.vmem [shape: f32[16,32], index: 3, kind: input, shape index: {}]   ;;  %s2935_s4 = inlined_call_operand.vmem [shape: f32[8,72], index: 4, kind: input, shape index: {}]   ;;  %s2936_s5 = inlined_call_operand.vmem [shape: f32[8,1], index: 5, kind: input, shape index: {}]   ;;  %s2937_s6 = inlined_call_operand.vmem [shape: f32[8,1], index: 6, kind: input, shape index: {}]   ;;  %s2938_s7 = inlined_call_operand.vmem [shape: f32[8,1], index: 7, kind: input, shape index: {}]   ;;  %s2939_s8 = inlined_call_operand.vmem [shape: f32[8,72], index: 8, kind: input, shape index: {}]   ;;  %s2940_s9 = inlined_call_operand.vmem [shape: f32[8,1], index: 9, kind: input, shape index: {}]   ;;  %s2941_s10 = inlined_call_operand.vmem [shape: f32[8,1], index: 10, kind: input, shape index: {}]   ;;  %s2942_s11 = inlined_call_operand.vmem [shape: f32[8,1], index: 11, kind: input, shape index: {}]   ;;  %s2943_s12 = inlined_call_operand.vmem [shape: f32[8,72], index: 12, kind: input, shape index: {}]   ;;  %s2944_s13 = inlined_call_operand.vmem [shape: f32[8,1], index: 13, kind: input, shape index: {}]   ;;  %s2945_s14 = inlined_call_operand.vmem [shape: f32[8,8], index: 14, kind: input, shape index: {}]   ;;  %s2946_s15 = inlined_call_operand.vmem [shape: f32[8,1], index: 15, kind: input, shape index: {}]   ;;  %s2947_s16 = inlined_call_operand.hbm [shape: f32[2,8,384], index: 16, kind: output, shape index: {}]  }
   0x1   :  { %2969 = sst [smem:[#allocation19_spill]] %s2931_s0 }
   0x2   :  { %2970 = sst [smem:[#allocation20_spill]] %s2933_s2 }
   0x3   :  { %2971 = sst [smem:[#allocation21_spill]] %s2945_s14 }
   0x4   :  { %2972 = sst [smem:[#allocation22_spill]] %s2947_s16 }
   0x5   :  { %21 = vsyncpa [#allocation4], 0 }
   0x6   :  { %23 = vsyncpa [#allocation4 + $0x1], 0 }
   0x7   :  { %24 = vsyncpa [#allocation7], 0 }
   0x8   :  { %25 = vsyncpa [#allocation5], 0 }
   0x9   :  { %27 = vsyncpa [#allocation5 + $0x1], 0  ;;  %s2316_s21 = smov 0   ;;  %s2318_s22 = smov 0  }
   0xa   :  { %s2320_s23 = smov 0   ;;  %s2322_s24 = smov 0  }
   0xb LB: > { %2973 = sst [smem:[#allocation12_spill]] %s2203_s21  ;;  %s2337_s25 = sadd.s32 4294967295, %s2215_s24   ;;  %s2215_s24 = sphi %s2322_s24, %s3007_s24   ;;  %s2211_s23 = sphi %s2320_s23, %s3009_s23   ;;  %s2207_s22 = sphi %s2318_s22, %s3011_s22   ;;  %s2203_s21 = sphi %s2316_s21, %s3010_s21  }
   0xc   : > { %2974 = sst [smem:[#allocation13_spill]] %s2211_s23  ;;  %s1871_s26 = sadd.s32 4294967294, %s2215_s24  }
   0xd   : > { %2975 = sst [smem:[#allocation14_spill]] %s2215_s24  ;;  %p79_p0 = scmp.ne.s32.totalorder %s2207_s22, %s2203_s21 }
   0xe   : > { %p2949_p1 = scmp.eq.s32.totalorder %s2337_s25, 0  ;;  %p403_p3 = scmp.eq.s32.totalorder %s1871_s26, 1 }
   0xf   : > { %p1872_p5 = scmp.ge.s32.totalorder %s2215_s24, 1  ;;  %p410_p7 = scmp.lt.s32.totalorder %s2215_s24, 3 }
  0x10   : > { %p2346_p4 = por %p2949_p1, %p79_p0  ;;  %p2351_p6 = por %p403_p3, %p79_p0 }
  0x11   : > { %p2356_p8 = pnand %p1872_p5, %p410_p7  ;;  %s2217_s30 = smov [#allocation6]  }
  0x12   : > { %s2976_s27 = scalar_select %p2346_p4, 1, 0 }
  0x13   : > { %s2977_s28 = scalar_select %p2351_p6, 1, 0 }
  0x14   : > { %s2979_s29 = scalar_select %p2356_p8, 1, 0 }
  0x15   : > { %2978 = sst [smem:[#allocation15_spill]] %s2977_s28  ;;  %s423_s0 = sshll.u32 %s2217_s30, 4  ;;  %s424_s0 = int_to_ptr.vmem [resolvable:$true] %s423_s0 }
  0x16   : > { %p2014_p10 = pneg %p2356_p8  ;;  %s2364_s17 = sadd.s32 1, %s2215_s24  }
  0x17   : > { %2980 = sst [smem:[#allocation16_spill]] %s2364_s17  ;;  %s63_s19 = ssub.s32 %s2215_s24, %s2364_s17 }
  0x18   : > { %p2368_p11 = pnand %p2014_p10, %p2949_p1  ;;  %p2374_p12 = scmp.eq.s32.totalorder %s63_s19, 0 }
  0x19   : > { %s66_s26 = sadd.s32 1, %s2211_s23  ;;  %p73_p13 = scmp.ne.s32.totalorder %s2211_s23, %s2207_s22 }
  0x1a   : > { %p2095_p0 = pneg %p2368_p11  ;;  %s2104_s30 = scalar_lea.vmem %s424_s0, 48 }
  0x1b   : > { %p2105_p3 = scmp.ne.s32.totalorder %s424_s0, %s2104_s30  ;;  %s2111_s28 = scalar_lea.vmem %s424_s0, 64 }
  0x1c   : > { %p2112_p9 = scmp.lt.s32.totalorder %s424_s0, %s424_s0  ;;  %p2113_p10 = scmp.lt.s32.totalorder %s2111_s28, %s2104_s30 }
  0x1d   : > { %p2107_p5 = pnand %p2105_p3, %p2095_p0 }
  0x1e   : > { %p2114_p1 = por %p2113_p10, %p2112_p9 }
  0x1f   : > { %p2108_p7 = pneg %p2107_p5 }
  0x21   : > { %p2115_p2 = pnand %p2114_p1, %p2108_p7 }
  0x23   : > { %2118 = shalt.err (!%p2115_p2)
}
  0x24   : > { %s2983_s2 = sld [smem:[#allocation20_spill]]  ;;  %p74_p1 = scmp.eq.s32.totalorder %s2215_s24, 0 }
  0x25   : > { %s2391_s28 = scalar_select %p2374_p12, %s2211_s23, %s66_s26  }
  0x26   : > { %p2985_p2 = scmp.eq.s32.totalorder %s2337_s25, 1  ;;  %p2027_p0 = scmp.lt.s32.totalorder %s2215_s24, 2 }
  0x27   : > { %2984 = sst [smem:[#allocation17_spill]] %s2391_s28  ;;  %s481_s18 = sand.u32 1, %s2211_s23  }
  0x28   : > { %p2399_p9 = por %p2985_p2, %p73_p13  ;;  %p75_p3 = por %p74_p1, %p73_p13 }
  0x29   : > { %s1875_s30 = sshll.u32 %s2215_s24, 4  ;;  %s2124_s19 = scalar_lea.hbm %s2932_s1, 32 }
  0x2a   : > { %2017 = dma.hbm_to_vmem [thread:$0]  (!%p2368_p11), %s2983_s2, 48, %s424_s0, [#allocation7]  }
  0x2b   : > { %s2986_s17 = scalar_select %p2399_p9, 1, 0 }
  0x2c   : > { %s2412_s16 = scalar_lea.hbm %s2932_s1, %s1875_s30  ;;  %s484_s0 = scalar_lea.vmem [#allocation3], %s481_s18 }
  0x2d   : > { %2987 = sst [smem:[#allocation18_spill]] %s2986_s17  ;;  %s491_s20 = sshll.u32 %s484_s0, 4  ;;  %s492_s20 = int_to_ptr.vmem [resolvable:$true] %s491_s20 }
  0x2e   : > { %p2414_p11 = pnand %p2027_p0, %p75_p3  ;;  %s482_s2 = scalar_lea.sflag [#allocation4], %s481_s18 }
  0x2f   : > { %s2119_s28 = scalar_lea.hbm %s2412_s16, 16  ;;  %p2125_p10 = scmp.lt.s32.totalorder %s2412_s16, %s2932_s1 }
  0x30   : > { %p2120_p12 = scmp.ne.s32.totalorder %s2412_s16, %s2119_s28  ;;  %p2121_p13 = pneg %p2414_p11 }
  0x31   : > { %p2126_p1 = scmp.lt.s32.totalorder %s2124_s19, %s2119_s28 }
  0x32   : > { %p2122_p5 = pnand %p2121_p13, %p2120_p12 }
  0x33   : > { %p2127_p2 = por %p2126_p1, %p2125_p10 }
  0x34   : > { %p2123_p7 = pneg %p2122_p5 }
  0x36   : > { %p2128_p0 = pnand %p2127_p2, %p2123_p7 }
  0x38   : > { %2131 = shalt.err (!%p2128_p0)
}
  0x39   : > { %s2132_s0 = scalar_lea.vmem %s492_s20, 16  ;;  %s2218_s18 = smov [#allocation3]  }
  0x3a   : > { %p2133_p3 = scmp.ne.s32.totalorder %s492_s20, %s2132_s0  ;;  %s2137_s17 = sshll.u32 %s2218_s18, 4  ;;  %s2138_s17 = int_to_ptr.vmem [resolvable:$false] %s2137_s17 }
  0x3b   : > { %s2139_s14 = scalar_lea.vmem %s2138_s17, 32  ;;  %p2140_p12 = scmp.lt.s32.totalorder %s492_s20, %s2138_s17 }
  0x3c   : > { %p2135_p6 = pnand %p2133_p3, %p2121_p13  ;;  %p2141_p5 = scmp.lt.s32.totalorder %s2139_s14, %s2132_s0 }
  0x3e   : > { %p2136_p9 = pneg %p2135_p6  ;;  %p2142_p4 = por %p2141_p5, %p2140_p12 }
  0x40   : > { %p2143_p8 = pnand %p2142_p4, %p2136_p9 }
  0x42   : > { %2146 = shalt.err (!%p2143_p8)
}
  0x43   : > { %2021 = dma.hbm_to_vmem [thread:$0]  (!%p2414_p11), %s2412_s16, 16, %s492_s20, %s482_s2  }
  0x44   : > { %p2989_p7 = scmp.ne.s32.totalorder %s2979_s29, 0 }
  0x45   : > { %s2435_s23 = sand.u32 (!%p2989_p7), 1, %s2207_s22   ;;  %p2990_p6 = scmp.ne.s32.totalorder (!%p2989_p7), %s2976_s27, 0 }
  0x46   : > { %500 = sbr.rel (%p2989_p7) target bundleno = 1790 (0x6fe), region = 84  ;;  %s503_s24 = scalar_lea.sflag (!%p2989_p7), [#allocation4], %s2435_s23 }
  0x47   : > { %s505_s28 = scalar_lea.vmem (!%p2989_p7), [#allocation3], %s2435_s23 }
  0x4b   : > { %2190 = dma.done.wait (%p2990_p6), %s503_s24, 16  }
  0x4c   : > { %2192 = vsyncadd (%p2990_p6), %s503_s24, 4294967280  ;;  %p2991_p4 = scmp.eq.s32.totalorder %s2337_s25, 0 }
  0x4e   : > { %2194 = dma.done.wait (%p2991_p4), [#allocation7], 48   ;;  %p2992_p8 = pmov %p2991_p4 }
  0x4f   : > { %p562_p9 = scmp.lt.s32.totalorder %s2337_s25, 1  ;;  %v2219_v0 = vmov 0.0   ;;  %s2993_s27 = sld [smem:[#allocation19_spill]]  ;;  %vm2226_vm0 = vmmov 0   ;;  %v2227_v4 = vmov 0   ;;  %v859_v5 = vld [vmem:[%s2934_s3] sm:$0xff]  ;;  %v577_v13 = vlaneseq }
  0x50   : > { %2196 = vsyncadd (%p2992_p8), [#allocation7], 4294967248  ;;  %1923 = vmatprep.subr.mxu1 %v2219_v0  ;;  %782 = vmatprep.mubr.f32.mxu0 %v2219_v0  ;;  %s2220_s20 = smov 109   ;;  %s2221_s26 = smov 110   ;;  %v1881_v6 = vld [vmem:[%s505_s28] ss:$0 sm:$0xff] }
  0x51   : > { %s563_s2 = scalar_select %p562_p9, %s2337_s25, 1  ;;  %1941 = vmatprep.mubr.msk.f32.mxu1 %vm2226_vm0, %v2219_v0  ;;  %2074 = vset.pattern.permute.xlu0 %v2227_v4  ;;  %v868_v7 = vmul.f32 %v1881_v6, %v859_v5  ;;  %vm870_vm1 = vcmask 261120   ;;  %v860_v8 = vld [vmem:[%s2934_s3 + $0x8] sm:$0xff]  ;;  %v708_v12 = vld [vmem:[%s2936_s5] sm:$0xff]  ;;  %v2527_v14 = vand.u32 127, %v577_v13  ;;  %vm714_vm10 = vcmask 588800  }
  0x52   : > { %s2222_s21 = smov 111   ;;  %s2223_s30 = smov 127   ;;  %2075 = vset.pattern.permute.xlu1 %v2227_v4  ;;  %v869_v10 = vmul.f32 %v1881_v6, %v860_v8  ;;  %v707_v60 = vld [vmem:[%s2935_s4] sm:$0xff]  ;;  %v896_v8 = vshrl.u32 %v577_v13, 7  ;;  %vm1616_vm11 = vcmask 64512  }
  0x53   : > { %s1992_s14 = smul.u32 24, %s563_s2  ;;  %s2967_s19 = smov 1   ;;  %v871_v9 = vsel %vm870_vm1, %v868_v7, 0.0  ;;  %vm673_vm2 = vcmp.lt.s32.totalorder %v2527_v14, 109  ;;  %vm660_vm3 = vcmp.lt.s32.totalorder %v2527_v14, 110  ;;  %vm647_vm4 = vcmp.lt.s32.totalorder %v2527_v14, 111 }
  0x54   : > { %s2965_s0 = smov 17   ;;  %s2961_s18 = smov 18   ;;  %v874_v11 = vsel %vm870_vm1, %v869_v10, 0.0  ;;  %vm634_vm5 = vcmp.lt.s32.totalorder %v2527_v14, 127  ;;  %vm618_vm6 = vcmp.lt.s32.totalorder %v2527_v14, 1  ;;  %vm605_vm7 = vcmp.lt.s32.totalorder %v2527_v14, 17 }
  0x55   : > { %s2454_s17 = scalar_lea.vmem %s2993_s27, %s1992_s14  ;;  %s2963_s24 = smov 19   ;;  %vm592_vm8 = vcmp.lt.s32.totalorder %v2527_v14, 18  ;;  %vm579_vm9 = vcmp.lt.s32.totalorder %v2527_v14, 19 }
  0x56   : > { %v2457_v1 = vld [vmem:[%s2454_s17 + $0x8] sm:$0xff]  ;;  %v2460_v2 = vld [vmem:[%s2454_s17] sm:$0xff]  ;;  %v2467_v3 = vld [vmem:[%s2454_s17 + $0x10] sm:$0xff] }
  0x57   : > { %669 = vrot.lane.b32.xlu0 %v2457_v1, %s2220_s20  ;;  %667 = vrot.lane.b32.xlu1 %v2460_v2, %s2220_s20  ;;  %v2092_v14 = vld [vmem:[%s2454_s17 + $0x10] sm:$0xff] }
  0x5b   : > { %671 = vrot.lane.b32.xlu0 %v2467_v3, %s2220_s20  ;;  %656 = vrot.lane.b32.xlu1 %v2457_v1, %s2221_s26 }
  0x5f   : > { %658 = vrot.lane.b32.xlu0 %v2467_v3, %s2221_s26  ;;  %654 = vrot.lane.b32.xlu1 %v2460_v2, %s2221_s26 }
  0x63   : > { %643 = vrot.lane.b32.xlu0 %v2457_v1, %s2222_s21  ;;  %645 = vrot.lane.b32.xlu1 %v2467_v3, %s2222_s21 }
  0x67   : > { %641 = vrot.lane.b32.xlu0 %v2460_v2, %s2222_s21  ;;  %630 = vrot.lane.b32.xlu1 %v2457_v1, %s2223_s30 }
  0x6b   : > { %632 = vrot.lane.b32.xlu0 %v2467_v3, %s2223_s30  ;;  %628 = vrot.lane.b32.xlu1 %v2460_v2, %s2223_s30 }
  0x6f   : > { %612 = vrot.lane.b32.xlu0 %v2460_v2, %s2967_s19  ;;  %614 = vrot.lane.b32.xlu1 %v2457_v1, %s2967_s19 }
  0x73   : > { %616 = vrot.lane.b32.xlu0 %v2467_v3, %s2967_s19  ;;  %599 = vrot.lane.b32.xlu1 %v2460_v2, %s2965_s0 }
  0x77   : > { %601 = vrot.lane.b32.xlu0 %v2457_v1, %s2965_s0  ;;  %603 = vrot.lane.b32.xlu1 %v2467_v3, %s2965_s0 }
  0x7b   : > { %586 = vrot.lane.b32.xlu0 %v2460_v2, %s2961_s18  ;;  %588 = vrot.lane.b32.xlu1 %v2457_v1, %s2961_s18 }
  0x7f   : > { %590 = vrot.lane.b32.xlu0 %v2467_v3, %s2961_s18  ;;  %571 = vrot.lane.b32.xlu1 %v2460_v2, %s2963_s24 }
  0x83   : > { %573 = vrot.lane.b32.xlu0 %v2457_v1, %s2963_s24  ;;  %575 = vrot.lane.b32.xlu1 %v2467_v3, %s2963_s24 }
  0xa2   : > { %872 = vadd.xlane.f32.xlu0 %v871_v9 }
  0xa7   : > { %875 = vadd.xlane.f32.xlu1 %v874_v11 }
  0xb8   : > { %711 = vperm.xlu0 %2074, %v708_v12   ;;  %v897_v12 = vsub.s32 0, %v896_v8 }
  0xc9   : > { %v670_v15 = vpop.permute.xlu0 %669  ;;  %v668_v16 = vpop.permute.xlu1 %667 }
  0xca   : > { %v675_v21 = vsel %vm673_vm2, %v668_v16, %v670_v15 }
  0xcd   : > { %v672_v17 = vpop.permute.xlu0 %671  ;;  %v657_v18 = vpop.permute.xlu1 %656 }
  0xce   : > { %v674_v19 = vsel %vm673_vm2, %v670_v15, %v672_v17  ;;  %v676_v20 = vsel %vm673_vm2, %v672_v17, %v668_v16 }
  0xcf   : > { %732 = vmatprep.subr.mxu0 %v674_v19  ;;  %1924 = vmatpush3.msra.mxu1 %v676_v20 }
  0xd0   : > { %733 = vmatpush1.msra.mxu0 %v675_v21  ;;  %1925 = vmatprep.subr.mxu1 %v2219_v0 }
  0xd1   : > { %v659_v22 = vpop.permute.xlu0 %658  ;;  %v655_v23 = vpop.permute.xlu1 %654 }
  0xd2   : > { %v661_v24 = vsel %vm660_vm3, %v657_v18, %v659_v22  ;;  %v663_v25 = vsel %vm660_vm3, %v659_v22, %v655_v23  ;;  %v662_v26 = vsel %vm660_vm3, %v655_v23, %v657_v18  ;;  %v570_v18 = vld [vmem:[#allocation6] sm:$0x7]  ;;  %v901_v23 = vsub.s32 1, %v896_v8 }
  0xd3   : > { %734 = vmatprep.subr.mxu0 %v661_v24  ;;  %1926 = vmatpush3.msra.mxu1 %v663_v25  ;;  %v2606_v25 = vrot.slane %v570_v18, %v897_v12 }
  0xd4   : > { %735 = vmatpush1.msra.mxu0 %v662_v26  ;;  %1927 = vmatprep.subr.mxu1 %v2219_v0 }
  0xd5   : > { %v644_v27 = vpop.permute.xlu0 %643  ;;  %v646_v28 = vpop.permute.xlu1 %645 }
  0xd6   : > { %v648_v29 = vsel %vm647_vm4, %v644_v27, %v646_v28 }
  0xd7   : > { %736 = vmatprep.subr.mxu0 %v648_v29 }
  0xd9   : > { %v642_v30 = vpop.permute.xlu0 %641  ;;  %v631_v31 = vpop.permute.xlu1 %630 }
  0xda   : > { %v649_v32 = vsel %vm647_vm4, %v642_v30, %v644_v27  ;;  %v650_v33 = vsel %vm647_vm4, %v646_v28, %v642_v30  ;;  %v905_v27 = vsub.s32 2, %v896_v8 }
  0xdb   : > { %737 = vmatpush1.msra.mxu0 %v649_v32  ;;  %1928 = vmatpush3.msra.mxu1 %v650_v33  ;;  %v2608_v33 = vrot.slane %v570_v18, %v901_v23  ;;  %v1102_v23 = vld [vmem:[%s2940_s9] sm:$0xff] }
  0xdc   : > { %1929 = vmatprep.subr.mxu1 %v2219_v0 }
  0xdd   : > { %v633_v34 = vpop.permute.xlu0 %632  ;;  %v629_v35 = vpop.permute.xlu1 %628 }
  0xde   : > { %v635_v36 = vsel %vm634_vm5, %v631_v31, %v633_v34  ;;  %v637_v37 = vsel %vm634_vm5, %v633_v34, %v629_v35  ;;  %v636_v38 = vsel %vm634_vm5, %v629_v35, %v631_v31 }
  0xdf   : > { %738 = vmatprep.subr.mxu0 %v635_v36  ;;  %1930 = vmatpush3.msra.mxu1 %v637_v37  ;;  %v2611_v37 = vrot.slane %v570_v18, %v905_v27 }
  0xe0   : > { %739 = vmatpush1.msra.mxu0 %v636_v38  ;;  %1931 = vmatprep.subr.mxu1 %v2219_v0 }
  0xe1   : > { %v613_v39 = vpop.permute.xlu0 %612  ;;  %740 = vmatprep.subr.mxu0 %v2457_v1  ;;  %v615_v40 = vpop.permute.xlu1 %614  ;;  %1932 = vmatpush3.msra.mxu1 %v2467_v3 }
  0xe2   : > { %741 = vmatpush1.msra.mxu0 %v2460_v2  ;;  %v620_v41 = vsel %vm618_vm6, %v613_v39, %v615_v40  ;;  %1933 = vmatprep.subr.mxu1 %v2219_v0 }
  0xe3   : > { %742 = vmatprep.subr.mxu0 %v620_v41 }
  0xe5   : > { %v617_v42 = vpop.permute.xlu0 %616  ;;  %v600_v43 = vpop.permute.xlu1 %599 }
  0xe6   : > { %v621_v44 = vsel %vm618_vm6, %v617_v42, %v613_v39  ;;  %v619_v45 = vsel %vm618_vm6, %v615_v40, %v617_v42 }
  0xe7   : > { %743 = vmatpush1.msra.mxu0 %v621_v44  ;;  %1934 = vmatpush3.msra.mxu1 %v619_v45 }
  0xe8   : > { %1935 = vmatprep.subr.mxu1 %v2219_v0 }
  0xe9   : > { %v602_v46 = vpop.permute.xlu0 %601  ;;  %v604_v47 = vpop.permute.xlu1 %603 }
  0xea   : > { %v607_v48 = vsel %vm605_vm7, %v600_v43, %v602_v46  ;;  %v606_v49 = vsel %vm605_vm7, %v602_v46, %v604_v47  ;;  %v608_v50 = vsel %vm605_vm7, %v604_v47, %v600_v43  ;;  %v954_v47 = vld [vmem:[%s2937_s6] sm:$0xff] }
  0xeb   : > { %744 = vmatprep.subr.mxu0 %v607_v48  ;;  %1936 = vmatpush3.msra.mxu1 %v606_v49  ;;  %v963_v48 = vld [vmem:[%s2938_s7] sm:$0xff] }
  0xec   : > { %745 = vmatpush1.msra.mxu0 %v608_v50  ;;  %1937 = vmatprep.subr.mxu1 %v2219_v0 }
  0xed   : > { %v587_v51 = vpop.permute.xlu0 %586  ;;  %v589_v52 = vpop.permute.xlu1 %588 }
  0xee   : > { %v594_v53 = vsel %vm592_vm8, %v587_v51, %v589_v52 }
  0xef   : > { %746 = vmatprep.subr.mxu0 %v594_v53 }
  0xf1   : > { %v591_v54 = vpop.permute.xlu0 %590  ;;  %v572_v55 = vpop.permute.xlu1 %571 }
  0xf2   : > { %v595_v56 = vsel %vm592_vm8, %v591_v54, %v587_v51  ;;  %v593_v57 = vsel %vm592_vm8, %v589_v52, %v591_v54 }
  0xf3   : > { %747 = vmatpush1.msra.mxu0 %v595_v56  ;;  %1938 = vmatpush3.msra.mxu1 %v593_v57 }
  0xf4   : > { %1939 = vmatprep.subr.mxu1 %v2219_v0 }
  0xf5   : > { %v574_v58 = vpop.permute.xlu0 %573  ;;  %v576_v59 = vpop.permute.xlu1 %575 }
  0xf6   : > { %v581_v61 = vsel %vm579_vm9, %v572_v55, %v574_v58  ;;  %v580_v62 = vsel %vm579_vm9, %v574_v58, %v576_v59  ;;  %v582_v63 = vsel %vm579_vm9, %v576_v59, %v572_v55 }
  0xf7   : > { %748 = vmatprep.subr.mxu0 %v581_v61  ;;  %1940 = vmatpush3.msra.mxu1 %v580_v62 }
  0xf8   : > { %749 = vmatpush1.msra.mxu0 %v582_v63  ;;  %1942 = vmatmul.mubr.msk.f32.vlgmr.msra.gmra.mxu1 %vm714_vm10, %v707_v60 }
  0xf9   : > { %1879 = vmatmul.mubr.msk.f32.vlgmr.msra.gmra.mxu0 %vm714_vm10, %v707_v60  ;;  %1944 = vmatprep.subr.mxu1 %v2219_v0 }
  0xfa   : > { %1962 = vmatprep.mubr.msk.f32.mxu1 %vm2226_vm0, %v2219_v0  ;;  %1175 = vmatprep.mubr.f32.mxu0 %v2219_v0 }
 0x12b   : > { %v873_v1 = vpop.xlane.xlu0 %872 }
 0x12c   : > { %v879_v2 = vmul.f32 0.70710677, %v873_v1  ;;  %v877_v6 = vmul.f32 0.5, %v873_v1 }
 0x12e   : > { %2076 = verf.f32 %v879_v2 }
 0x130   : > { %v876_v3 = vpop.xlane.xlu1 %875 }
 0x131   : > { %v880_v4 = vmul.f32 0.70710677, %v876_v3  ;;  %v878_v15 = vmul.f32 0.5, %v876_v3 }
 0x133   : > { %2078 = verf.f32 %v880_v4  ;;  %v712_v11 = vpop.permute.xlu0 %711 }
 0x13b   : > { %v2077_v5 = vpop.eup %2076 }
 0x13c   : > { %v883_v7 = vadd.f32 1.0, %v2077_v5 }
 0x13e   : > { %v885_v10 = vmul.f32 %v883_v7, %v877_v6 }
 0x140   : > { %v2079_v9 = vpop.eup %2078  ;;  %v887_v21 = vadd.f32 1.0, %v885_v10 }
 0x141   : > { %v884_v16 = vadd.f32 1.0, %v2079_v9 }
 0x143   : > { %v886_v28 = vmul.f32 %v884_v16, %v878_v15 }
 0x1b8   : > { %v855_v17 = vpop.f32.mrf.mxu1 }
 0x1b9   : > { %v856_v19 = vadd.f32 %v855_v17, %v712_v11  ;;  %v784_v20 = vpop.f32.mrf.mxu0 }
 0x1ba   : > { %v785_v22 = vadd.f32 %v784_v20, %v712_v11  ;;  %v1943_v24 = vpop.f32.mrf.mxu1 }
 0x1bb   : > { %v786_v26 = vpop.f32.mrf.mxu0  ;;  %v890_v13 = vmul.f32 %v887_v21, %v856_v19 }
 0x1bc   : > { %v888_v29 = vmul.f32 %v887_v21, %v785_v22  ;;  %v787_v30 = vadd.f32 %v786_v26, %v712_v11 }
 0x1bd   : > { %v893_v34 = vadd.f32 %v890_v13, %v886_v28 }
 0x1be   : > { %v891_v31 = vadd.f32 %v888_v29, %v886_v28  ;;  %v889_v32 = vmul.f32 %v887_v21, %v787_v30 }
 0x1bf   : > { %v912_v39 = vmul.f32 %v2611_v37, %v893_v34 }
 0x1c0   : > { %v910_v35 = vmul.f32 %v2606_v25, %v891_v31  ;;  %v892_v36 = vadd.f32 %v889_v32, %v886_v28 }
 0x1c1   : > { %v926_v45 = vmul.f32 %v912_v39, %v912_v39 }
 0x1c2   : > { %v911_v38 = vmul.f32 %v2608_v33, %v892_v36  ;;  %v924_v41 = vmul.f32 %v910_v35, %v910_v35 }
 0x1c4   : > { %v913_v40 = vadd.f32 %v911_v38, %v910_v35  ;;  %v925_v42 = vmul.f32 %v911_v38, %v911_v38 }
 0x1c6   : > { %v914_v43 = vadd.f32 %v913_v40, %v912_v39  ;;  %v927_v44 = vadd.f32 %v925_v42, %v924_v41 }
 0x1c8   : > { %915 = vadd.xlane.f32.xlu1 %v914_v43  ;;  %v928_v46 = vadd.f32 %v927_v44, %v926_v45 }
 0x1cc   : > { %929 = vadd.xlane.f32.xlu1 %v928_v46 }
 0x1dd   : > { %957 = vperm.xlu1 %2075, %v954_v47  }
 0x1e1   : > { %966 = vperm.xlu1 %2075, %v963_v48  }
 0x251   : > { %v916_v49 = vpop.xlane.xlu1 %915 }
 0x252   : > { %v917_v50 = vrot.slane %v916_v49, 4 }
 0x254   : > { %v918_v51 = vadd.f32 %v917_v50, %v916_v49 }
 0x255   : > { %v930_v52 = vpop.xlane.xlu1 %929 }
 0x256   : > { %v919_v53 = vrot.slane %v918_v51, 2  ;;  %v931_v54 = vrot.slane %v930_v52, 4 }
 0x258   : > { %v932_v55 = vadd.f32 %v931_v54, %v930_v52  ;;  %v920_v56 = vadd.f32 %v919_v53, %v918_v51 }
 0x259   : > { %v958_v3 = vpop.permute.xlu1 %957 }
 0x25a   : > { %v933_v57 = vrot.slane %v932_v55, 2  ;;  %v921_v58 = vrot.slane %v920_v56, 1 }
 0x25c   : > { %v922_v59 = vadd.f32 %v921_v58, %v920_v56  ;;  %v934_v60 = vadd.f32 %v933_v57, %v932_v55 }
 0x25d   : > { %v967_v16 = vpop.permute.xlu1 %966 }
 0x25e   : > { %1993 = vpush %v922_v59  ;;  %v935_v61 = vrot.slane %v934_v60, 1 }
 0x260   : > { %v936_v62 = vadd.f32 %v935_v61, %v934_v60 }
 0x262   : > { %1995 = vpush %v936_v62 }
 0x28f   : > { %s1994_s27 = spop %1993 }
 0x290   : > { %s938_s28 = smul.f32 0.00048828125, %s1994_s27  ;;  %s2995_s27 = smov 19  }
 0x292   : > { %s940_s18 = smul.f32 %s938_s28, %s938_s28  ;;  %v946_v2 = vstv %s938_s28 }
 0x293   : > { %s1996_s2 = spop %1995  ;;  %v947_v4 = vsub.f32 %v910_v35, %v946_v2  ;;  %v948_v5 = vsub.f32 %v911_v38, %v946_v2  ;;  %v949_v6 = vsub.f32 %v912_v39, %v946_v2 }
 0x294   : > { %s939_s14 = smul.f32 0.00048828125, %s1996_s2 }
 0x296   : > { %s941_s16 = ssub.f32 %s939_s14, %s940_s18 }
 0x298   : > { %s942_s29 = sadd.f32 1e-05, %s941_s16 }
 0x29a   : > { %v943_v63 = vstv %s942_s29 }
 0x29b   : > { %2080 = vrsqrt.f32 %v943_v63 }
 0x2a8   : > { %v2081_v1 = vpop.eup %2080 }
 0x2a9   : > { %1997 = vpush %v2081_v1 }
 0x2da   : > { %s1998_s24 = spop %1997 }
 0x2db   : > { %v950_v7 = vstv %s1998_s24  ;;  %s2994_s24 = smov 18  }
 0x2dc   : > { %v951_v8 = vmul.f32 %v950_v7, %v947_v4  ;;  %v952_v9 = vmul.f32 %v950_v7, %v948_v5  ;;  %v953_v10 = vmul.f32 %v950_v7, %v949_v6 }
 0x2de   : > { %v960_v11 = vmul.f32 %v958_v3, %v951_v8  ;;  %v961_v12 = vmul.f32 %v958_v3, %v952_v9  ;;  %v962_v15 = vmul.f32 %v958_v3, %v953_v10  ;;  %v1101_v8 = vld [vmem:[%s2939_s8] sm:$0xff] }
 0x2e0   : > { %v970_v17 = vadd.f32 %v967_v16, %v961_v12  ;;  %v969_v18 = vadd.f32 %v967_v16, %v960_v11  ;;  %v971_v19 = vadd.f32 %v967_v16, %v962_v15 }
 0x2e2   : > { %v2622_v20 = vmul.f32 %v970_v17, %v2608_v33  ;;  %v2629_v21 = vmul.f32 %v969_v18, %v2606_v25  ;;  %v2632_v22 = vmul.f32 %v971_v19, %v2611_v37 }
 0x2e4   : > { %1052 = vrot.lane.b32.xlu0 %v2622_v20, %s2221_s26  ;;  %1064 = vrot.lane.b32.xlu1 %v2622_v20, %s2220_s20 }
 0x2e8   : > { %1066 = vrot.lane.b32.xlu1 %v2632_v22, %s2220_s20  ;;  %1050 = vrot.lane.b32.xlu0 %v2629_v21, %s2221_s26 }
 0x2ec   : > { %1042 = vrot.lane.b32.xlu0 %v2632_v22, %s2222_s21  ;;  %1062 = vrot.lane.b32.xlu1 %v2629_v21, %s2220_s20 }
 0x2f0   : > { %1028 = vrot.lane.b32.xlu0 %v2622_v20, %s2223_s30  ;;  %1054 = vrot.lane.b32.xlu1 %v2632_v22, %s2221_s26 }
 0x2f4   : > { %1026 = vrot.lane.b32.xlu0 %v2629_v21, %s2223_s30  ;;  %1040 = vrot.lane.b32.xlu1 %v2622_v20, %s2222_s21 }
 0x2f8   : > { %1013 = vrot.lane.b32.xlu0 %v2622_v20, %s2967_s19  ;;  %1038 = vrot.lane.b32.xlu1 %v2629_v21, %s2222_s21 }
 0x2fc   : > { %999 = vrot.lane.b32.xlu0 %v2629_v21, %s2965_s0  ;;  %1030 = vrot.lane.b32.xlu1 %v2632_v22, %s2223_s30 }
 0x300   : > { %1003 = vrot.lane.b32.xlu0 %v2632_v22, %s2965_s0  ;;  %1011 = vrot.lane.b32.xlu1 %v2629_v21, %s2967_s19 }
 0x304   : > { %989 = vrot.lane.b32.xlu0 %v2622_v20, %s2994_s24  ;;  %1015 = vrot.lane.b32.xlu1 %v2632_v22, %s2967_s19 }
 0x308   : > { %975 = vrot.lane.b32.xlu0 %v2629_v21, %s2995_s27  ;;  %1001 = vrot.lane.b32.xlu1 %v2622_v20, %s2965_s0 }
 0x30c   : > { %979 = vrot.lane.b32.xlu0 %v2632_v22, %s2995_s27  ;;  %987 = vrot.lane.b32.xlu1 %v2629_v21, %s2994_s24 }
 0x310   : > { %991 = vrot.lane.b32.xlu1 %v2632_v22, %s2994_s24 }
 0x314   : > { %977 = vrot.lane.b32.xlu1 %v2622_v20, %s2995_s27 }
 0x318   : > { %1105 = vperm.xlu1 %2075, %v1102_v23  }
 0x356   : > { %v1053_v24 = vpop.permute.xlu0 %1052  ;;  %v1065_v26 = vpop.permute.xlu1 %1064 }
 0x35a   : > { %v1067_v27 = vpop.permute.xlu1 %1066  ;;  %v1051_v28 = vpop.permute.xlu0 %1050 }
 0x35b   : > { %v1068_v13 = vsel %vm673_vm2, %v1065_v26, %v1067_v27  ;;  %v1057_v39 = vsel %vm660_vm3, %v1051_v28, %v1053_v24 }
 0x35c   : > { %1125 = vmatprep.subr.mxu0 %v1068_v13 }
 0x35e   : > { %v1043_v29 = vpop.permute.xlu0 %1042  ;;  %v1063_v30 = vpop.permute.xlu1 %1062 }
 0x35f   : > { %v1069_v31 = vsel %vm673_vm2, %v1063_v30, %v1065_v26  ;;  %v1070_v32 = vsel %vm673_vm2, %v1067_v27, %v1063_v30 }
 0x360   : > { %1126 = vmatpush1.msra.mxu0 %v1069_v31  ;;  %1945 = vmatpush3.msra.mxu1 %v1070_v32 }
 0x361   : > { %1946 = vmatprep.subr.mxu1 %v2219_v0 }
 0x362   : > { %v1029_v34 = vpop.permute.xlu0 %1028  ;;  %v1055_v35 = vpop.permute.xlu1 %1054 }
 0x363   : > { %v1058_v36 = vsel %vm660_vm3, %v1055_v35, %v1051_v28  ;;  %v1056_v38 = vsel %vm660_vm3, %v1053_v24, %v1055_v35 }
 0x364   : > { %1127 = vmatprep.subr.mxu0 %v1056_v38  ;;  %1947 = vmatpush3.msra.mxu1 %v1058_v36 }
 0x365   : > { %1128 = vmatpush1.msra.mxu0 %v1057_v39  ;;  %1948 = vmatprep.subr.mxu1 %v2219_v0 }
 0x366   : > { %v1027_v40 = vpop.permute.xlu0 %1026  ;;  %v1041_v41 = vpop.permute.xlu1 %1040 }
 0x367   : > { %v1044_v42 = vsel %vm647_vm4, %v1041_v41, %v1043_v29  ;;  %v1033_v51 = vsel %vm634_vm5, %v1027_v40, %v1029_v34 }
 0x368   : > { %1129 = vmatprep.subr.mxu0 %v1044_v42 }
 0x36a   : > { %v1014_v43 = vpop.permute.xlu0 %1013  ;;  %v1039_v44 = vpop.permute.xlu1 %1038 }
 0x36b   : > { %v1045_v45 = vsel %vm647_vm4, %v1039_v44, %v1041_v41  ;;  %v1046_v46 = vsel %vm647_vm4, %v1043_v29, %v1039_v44 }
 0x36c   : > { %1130 = vmatpush1.msra.mxu0 %v1045_v45  ;;  %1949 = vmatpush3.msra.mxu1 %v1046_v46 }
 0x36d   : > { %1950 = vmatprep.subr.mxu1 %v2219_v0 }
 0x36e   : > { %v1000_v47 = vpop.permute.xlu0 %999  ;;  %v1031_v48 = vpop.permute.xlu1 %1030 }
 0x36f   : > { %v1034_v49 = vsel %vm634_vm5, %v1031_v48, %v1027_v40  ;;  %v1032_v50 = vsel %vm634_vm5, %v1029_v34, %v1031_v48 }
 0x370   : > { %1131 = vmatprep.subr.mxu0 %v1032_v50  ;;  %1951 = vmatpush3.msra.mxu1 %v1034_v49  ;;  %v1320_v49 = vld [vmem:[%s2942_s11] sm:$0xff] }
 0x371   : > { %1132 = vmatpush1.msra.mxu0 %v1033_v51  ;;  %1952 = vmatprep.subr.mxu1 %v2219_v0  ;;  %v1311_v50 = vld [vmem:[%s2941_s10] sm:$0xff] }
 0x372   : > { %1133 = vmatprep.subr.mxu0 %v2622_v20  ;;  %1953 = vmatpush3.msra.mxu1 %v2632_v22  ;;  %v1012_v52 = vpop.permute.xlu1 %1011  ;;  %v1004_v53 = vpop.permute.xlu0 %1003 }
 0x373   : > { %1134 = vmatpush1.msra.mxu0 %v2629_v21  ;;  %v1018_v54 = vsel %vm618_vm6, %v1012_v52, %v1014_v43  ;;  %1954 = vmatprep.subr.mxu1 %v2219_v0  ;;  %v1007_v62 = vsel %vm605_vm7, %v1004_v53, %v1000_v47 }
 0x374   : > { %1135 = vmatprep.subr.mxu0 %v1018_v54 }
 0x376   : > { %v1016_v55 = vpop.permute.xlu1 %1015  ;;  %v990_v58 = vpop.permute.xlu0 %989 }
 0x377   : > { %v1017_v56 = vsel %vm618_vm6, %v1014_v43, %v1016_v55  ;;  %v1019_v57 = vsel %vm618_vm6, %v1016_v55, %v1012_v52 }
 0x378   : > { %1136 = vmatpush1.msra.mxu0 %v1019_v57  ;;  %1955 = vmatpush3.msra.mxu1 %v1017_v56 }
 0x379   : > { %1956 = vmatprep.subr.mxu1 %v2219_v0 }
 0x37a   : > { %v1002_v59 = vpop.permute.xlu1 %1001  ;;  %v976_v1 = vpop.permute.xlu0 %975 }
 0x37b   : > { %v1005_v60 = vsel %vm605_vm7, %v1002_v59, %v1004_v53  ;;  %v1006_v61 = vsel %vm605_vm7, %v1000_v47, %v1002_v59 }
 0x37c   : > { %1137 = vmatprep.subr.mxu0 %v1006_v61  ;;  %1957 = vmatpush3.msra.mxu1 %v1005_v60 }
 0x37d   : > { %1138 = vmatpush1.msra.mxu0 %v1007_v62  ;;  %1958 = vmatprep.subr.mxu1 %v2219_v0 }
 0x37e   : > { %v988_v63 = vpop.permute.xlu1 %987  ;;  %v980_v6 = vpop.permute.xlu0 %979 }
 0x37f   : > { %v994_v2 = vsel %vm592_vm8, %v988_v63, %v990_v58  ;;  %v983_v11 = vsel %vm579_vm9, %v980_v6, %v976_v1 }
 0x380   : > { %1139 = vmatprep.subr.mxu0 %v994_v2 }
 0x382   : > { %v992_v3 = vpop.permute.xlu1 %991 }
 0x383   : > { %v993_v4 = vsel %vm592_vm8, %v990_v58, %v992_v3  ;;  %v995_v5 = vsel %vm592_vm8, %v992_v3, %v988_v63 }
 0x384   : > { %1140 = vmatpush1.msra.mxu0 %v995_v5  ;;  %1959 = vmatpush3.msra.mxu1 %v993_v4 }
 0x385   : > { %1960 = vmatprep.subr.mxu1 %v2219_v0 }
 0x386   : > { %v978_v7 = vpop.permute.xlu1 %977 }
 0x387   : > { %v981_v9 = vsel %vm579_vm9, %v978_v7, %v980_v6  ;;  %v982_v10 = vsel %vm579_vm9, %v976_v1, %v978_v7 }
 0x388   : > { %1141 = vmatprep.subr.mxu0 %v982_v10  ;;  %1961 = vmatpush3.msra.mxu1 %v981_v9 }
 0x389   : > { %1142 = vmatpush1.msra.mxu0 %v983_v11  ;;  %1963 = vmatmul.mubr.msk.f32.vlgmr.msra.gmra.mxu1 %vm714_vm10, %v1101_v8 }
 0x38a   : > { %1882 = vmatmul.mubr.msk.f32.vlgmr.msra.gmra.mxu0 %vm714_vm10, %v1101_v8  ;;  %1965 = vmatprep.subr.mxu1 %v2219_v0 }
 0x38b   : > { %1983 = vmatprep.mubr.msk.f32.mxu1 %vm2226_vm0, %v2219_v0  ;;  %1532 = vmatprep.mubr.f32.mxu0 %v2219_v0 }
 0x393   : > { %v1106_v12 = vpop.permute.xlu1 %1105 }
 0x449   : > { %v1248_v15 = vpop.f32.mrf.mxu1 }
 0x44a   : > { %v1249_v16 = vadd.f32 %v1248_v15, %v1106_v12  ;;  %v1177_v17 = vpop.f32.mrf.mxu0 }
 0x44b   : > { %v1178_v18 = vadd.f32 %v1177_v17, %v1106_v12  ;;  %v1964_v19 = vpop.f32.mrf.mxu1 }
 0x44c   : > { %v1257_v20 = vmul.f32 0.70710677, %v1249_v16  ;;  %v1179_v21 = vpop.f32.mrf.mxu0  ;;  %v1254_v13 = vmul.f32 0.5, %v1249_v16 }
 0x44d   : > { %v1255_v22 = vmul.f32 0.70710677, %v1178_v18  ;;  %v1180_v23 = vadd.f32 %v1179_v21, %v1106_v12  ;;  %v1252_v29 = vmul.f32 0.5, %v1178_v18 }
 0x44e   : > { %2082 = verf.f32 %v1257_v20 }
 0x44f   : > { %2084 = verf.f32 %v1255_v22  ;;  %v1256_v24 = vmul.f32 0.70710677, %v1180_v23  ;;  %v1253_v35 = vmul.f32 0.5, %v1180_v23 }
 0x451   : > { %2086 = verf.f32 %v1256_v24 }
 0x45b   : > { %v2083_v26 = vpop.eup %2082 }
 0x45c   : > { %v2085_v27 = vpop.eup %2084  ;;  %v1263_v28 = vadd.f32 1.0, %v2083_v26 }
 0x45d   : > { %v1261_v30 = vadd.f32 1.0, %v2085_v27 }
 0x45e   : > { %v2087_v31 = vpop.eup %2086  ;;  %v1266_v32 = vmul.f32 %v1263_v28, %v1254_v13 }
 0x45f   : > { %v1264_v34 = vmul.f32 %v1261_v30, %v1252_v29  ;;  %v1262_v36 = vadd.f32 1.0, %v2087_v31 }
 0x460   : > { %v1269_v41 = vmul.f32 %v1266_v32, %v2611_v37 }
 0x461   : > { %v1267_v38 = vmul.f32 %v1264_v34, %v2606_v25  ;;  %v1265_v39 = vmul.f32 %v1262_v36, %v1253_v35 }
 0x462   : > { %v1283_v46 = vmul.f32 %v1269_v41, %v1269_v41 }
 0x463   : > { %v1268_v40 = vmul.f32 %v1265_v39, %v2608_v33  ;;  %v1281_v43 = vmul.f32 %v1267_v38, %v1267_v38 }
 0x465   : > { %v1270_v42 = vadd.f32 %v1268_v40, %v1267_v38  ;;  %v1282_v44 = vmul.f32 %v1268_v40, %v1268_v40 }
 0x467   : > { %v1271_v45 = vadd.f32 %v1270_v42, %v1269_v41  ;;  %v1284_v47 = vadd.f32 %v1282_v44, %v1281_v43 }
 0x469   : > { %1272 = vadd.xlane.f32.xlu0 %v1271_v45  ;;  %v1285_v48 = vadd.f32 %v1284_v47, %v1283_v46 }
 0x46b   : > { %1286 = vadd.xlane.f32.xlu1 %v1285_v48 }
 0x47c   : > { %1323 = vperm.xlu1 %2075, %v1320_v49  }
 0x47f   : > { %1314 = vperm.xlu0 %2074, %v1311_v50  }
 0x4f2   : > { %v1273_v51 = vpop.xlane.xlu0 %1272 }
 0x4f3   : > { %v1274_v52 = vrot.slane %v1273_v51, 4 }
 0x4f4   : > { %v1287_v53 = vpop.xlane.xlu1 %1286 }
 0x4f5   : > { %v1275_v54 = vadd.f32 %v1274_v52, %v1273_v51  ;;  %v1288_v55 = vrot.slane %v1287_v53, 4 }
 0x4f7   : > { %v1276_v56 = vrot.slane %v1275_v54, 2  ;;  %v1289_v57 = vadd.f32 %v1288_v55, %v1287_v53 }
 0x4f8   : > { %v1324_v18 = vpop.permute.xlu1 %1323 }
 0x4f9   : > { %v1290_v58 = vrot.slane %v1289_v57, 2  ;;  %v1277_v59 = vadd.f32 %v1276_v56, %v1275_v54 }
 0x4fa   : > { %v1315_v12 = vpop.permute.xlu0 %1314 }
 0x4fb   : > { %v1278_v60 = vrot.slane %v1277_v59, 1  ;;  %v1291_v61 = vadd.f32 %v1290_v58, %v1289_v57 }
 0x4fd   : > { %v1279_v62 = vadd.f32 %v1278_v60, %v1277_v59  ;;  %v1292_v63 = vrot.slane %v1291_v61, 1 }
 0x4ff   : > { %1999 = vpush %v1279_v62  ;;  %v1293_v1 = vadd.f32 %v1292_v63, %v1291_v61 }
 0x501   : > { %2001 = vpush %v1293_v1 }
 0x530   : > { %s2000_s2 = spop %1999 }
 0x531   : > { %s1295_s14 = smul.f32 0.00048828125, %s2000_s2 }
 0x532   : > { %s2002_s16 = spop %2001 }
 0x533   : > { %s1297_s29 = smul.f32 %s1295_s14, %s1295_s14  ;;  %v1303_v4 = vstv %s1295_s14 }
 0x534   : > { %s1296_s28 = smul.f32 0.00048828125, %s2002_s16  ;;  %v1304_v5 = vsub.f32 %v1267_v38, %v1303_v4  ;;  %v1305_v6 = vsub.f32 %v1268_v40, %v1303_v4  ;;  %v1306_v7 = vsub.f32 %v1269_v41, %v1303_v4  ;;  %s2998_s16 = sld [smem:[#allocation21_spill]] }
 0x536   : > { %s1298_s18 = ssub.f32 %s1296_s28, %s1297_s29  ;;  %s1991_s29 = smul.u32 24, %s2435_s23 }
 0x537   : > { %s2999_s28 = sld [smem:[#allocation18_spill]] }
 0x538   : > { %s1299_s0 = sadd.f32 1e-05, %s1298_s18  ;;  %s561_s18 = scalar_lea.vmem [#allocation8], %s1991_s29 }
 0x53a   : > { %v1300_v2 = vstv %s1299_s0  ;;  %s1768_s0 = scalar_lea.sflag [#allocation5], %s2435_s23 }
 0x53b   : > { %2088 = vrsqrt.f32 %v1300_v2 }
 0x53d   : > { %p3001_p13 = scmp.ne.s32.totalorder %s2999_s28, 0 }
 0x548   : > { %v2089_v3 = vpop.eup %2088 }
 0x549   : > { %2003 = vpush %v2089_v3 }
 0x57a   : > { %s2004_s19 = spop %2003 }
 0x57b   : > { %v1307_v8 = vstv %s2004_s19 }
 0x57c   : > { %v1308_v9 = vmul.f32 %v1307_v8, %v1304_v5  ;;  %v1309_v10 = vmul.f32 %v1307_v8, %v1305_v6  ;;  %v1310_v11 = vmul.f32 %v1307_v8, %v1306_v7  ;;  %v1458_v8 = vld [vmem:[%s2943_s12] sm:$0xff] }
 0x57e   : > { %v1317_v15 = vmul.f32 %v1315_v12, %v1308_v9  ;;  %v1318_v16 = vmul.f32 %v1315_v12, %v1309_v10  ;;  %v1319_v17 = vmul.f32 %v1315_v12, %v1310_v11  ;;  %v2090_v12 = vld [vmem:[%s2454_s17 + $0x8] sm:$0xff] }
 0x580   : > { %v1327_v19 = vadd.f32 %v1324_v18, %v1318_v16  ;;  %v1328_v20 = vadd.f32 %v1324_v18, %v1319_v17  ;;  %v1326_v21 = vadd.f32 %v1324_v18, %v1317_v15  ;;  %v1609_v15 = vld [vmem:[%s2998_s16] sm:$0xff] }
 0x581   : > { %v2091_v16 = vld [vmem:[%s2454_s17] sm:$0xff]  ;;  %s2005_s17 = smul.u32 384, %s2337_s25  ;;  %s2230_s25 = smov [#allocation8]  }
 0x582   : > { %v2759_v22 = vmul.f32 %v1327_v19, %v2608_v33  ;;  %v2762_v23 = vmul.f32 %v1328_v20, %v2611_v37  ;;  %v2769_v24 = vmul.f32 %v1326_v21, %v2606_v25  ;;  %v1610_v25 = vld [vmem:[%s2946_s15] sm:$0xff] }
 0x583   : > { %v1459_v33 = vld [vmem:[%s2944_s13] sm:$0xff] }
 0x584   : > { %1423 = vrot.lane.b32.xlu1 %v2762_v23, %s2220_s20  ;;  %1421 = vrot.lane.b32.xlu0 %v2759_v22, %s2220_s20 }
 0x588   : > { %1409 = vrot.lane.b32.xlu1 %v2759_v22, %s2221_s26  ;;  %1419 = vrot.lane.b32.xlu0 %v2769_v24, %s2220_s20  ;;  %s2996_s20 = smov 1  }
 0x58c   : > { %1407 = vrot.lane.b32.xlu1 %v2769_v24, %s2221_s26  ;;  %1411 = vrot.lane.b32.xlu0 %v2762_v23, %s2221_s26  ;;  %s2997_s26 = smov 17  }
 0x590   : > { %1399 = vrot.lane.b32.xlu1 %v2762_v23, %s2222_s21  ;;  %1397 = vrot.lane.b32.xlu0 %v2759_v22, %s2222_s21 }
 0x594   : > { %1385 = vrot.lane.b32.xlu1 %v2759_v22, %s2223_s30  ;;  %1395 = vrot.lane.b32.xlu0 %v2769_v24, %s2222_s21 }
 0x598   : > { %1383 = vrot.lane.b32.xlu1 %v2769_v24, %s2223_s30  ;;  %1387 = vrot.lane.b32.xlu0 %v2762_v23, %s2223_s30  ;;  %s3000_s30 = sld [smem:[#allocation22_spill]] }
 0x59c   : > { %1370 = vrot.lane.b32.xlu1 %v2759_v22, %s2996_s20  ;;  %1368 = vrot.lane.b32.xlu0 %v2769_v24, %s2996_s20 }
 0x59e   : > { %s1780_s19 = scalar_lea.hbm %s3000_s30, %s2005_s17 }
 0x5a0   : > { %1356 = vrot.lane.b32.xlu1 %v2769_v24, %s2997_s26  ;;  %1372 = vrot.lane.b32.xlu0 %v2762_v23, %s2996_s20  ;;  %s1782_s20 = sshll.u32 %s561_s18, 4  ;;  %s1783_s20 = int_to_ptr.vmem [resolvable:$true] %s1782_s20 }
 0x5a4   : > { %1360 = vrot.lane.b32.xlu1 %v2762_v23, %s2997_s26  ;;  %1358 = vrot.lane.b32.xlu0 %v2759_v22, %s2997_s26 }
 0x5a8   : > { %1346 = vrot.lane.b32.xlu1 %v2759_v22, %s2994_s24  ;;  %1344 = vrot.lane.b32.xlu0 %v2769_v24, %s2994_s24 }
 0x5ac   : > { %1332 = vrot.lane.b32.xlu1 %v2769_v24, %s2995_s27  ;;  %1348 = vrot.lane.b32.xlu0 %v2762_v23, %s2994_s24  ;;  %s2147_s24 = scalar_lea.vmem %s1783_s20, 384 }
 0x5ad   : > { %p2148_p11 = scmp.ne.s32.totalorder %s1783_s20, %s2147_s24 }
 0x5af   : > { %p2149_p10 = pnand %p2148_p11, %p3001_p13 }
 0x5b0   : > { %1336 = vrot.lane.b32.xlu1 %v2762_v23, %s2995_s27  ;;  %1334 = vrot.lane.b32.xlu0 %v2759_v22, %s2995_s27  ;;  %s2151_s27 = sshll.u32 %s2230_s25, 4  ;;  %s2152_s27 = int_to_ptr.vmem [resolvable:$false] %s2151_s27 }
 0x5b1   : > { %p2150_p1 = pneg %p2149_p10  ;;  %s2153_s2 = scalar_lea.vmem %s2152_s27, 768 }
 0x5b2   : > { %p2154_p2 = scmp.lt.s32.totalorder %s1783_s20, %s2152_s27  ;;  %p2155_p0 = scmp.lt.s32.totalorder %s2153_s2, %s2147_s24 }
 0x5b4   : > { %1613 = vperm.xlu1 %2075, %v1610_v25   ;;  %1462 = vperm.xlu0 %2074, %v1459_v33   ;;  %p2156_p3 = por %p2155_p0, %p2154_p2 }
 0x5b6   : > { %p2157_p12 = pnand %p2156_p3, %p2150_p1 }
 0x5f6   : > { %v1424_v37 = vpop.permute.xlu1 %1423  ;;  %v1422_v26 = vpop.permute.xlu0 %1421 }
 0x5f7   : > { %v1425_v27 = vsel %vm673_vm2, %v1422_v26, %v1424_v37 }
 0x5f8   : > { %1482 = vmatprep.subr.mxu0 %v1425_v27 }
 0x5fa   : > { %v1410_v28 = vpop.permute.xlu1 %1409  ;;  %v1420_v13 = vpop.permute.xlu0 %1419 }
 0x5fb   : > { %v1426_v29 = vsel %vm673_vm2, %v1420_v13, %v1422_v26  ;;  %v1427_v30 = vsel %vm673_vm2, %v1424_v37, %v1420_v13 }
 0x5fc   : > { %1483 = vmatpush1.msra.mxu0 %v1426_v29  ;;  %1966 = vmatpush3.msra.mxu1 %v1427_v30 }
 0x5fd   : > { %1967 = vmatprep.subr.mxu1 %v2219_v0 }
 0x5fe   : > { %v1408_v31 = vpop.permute.xlu1 %1407  ;;  %v1412_v32 = vpop.permute.xlu0 %1411 }
 0x5ff   : > { %v1414_v34 = vsel %vm660_vm3, %v1408_v31, %v1410_v28  ;;  %v1415_v35 = vsel %vm660_vm3, %v1412_v32, %v1408_v31  ;;  %v1413_v36 = vsel %vm660_vm3, %v1410_v28, %v1412_v32 }
 0x600   : > { %1484 = vmatprep.subr.mxu0 %v1413_v36  ;;  %1968 = vmatpush3.msra.mxu1 %v1415_v35 }
 0x601   : > { %1485 = vmatpush1.msra.mxu0 %v1414_v34  ;;  %1969 = vmatprep.subr.mxu1 %v2219_v0 }
 0x602   : > { %v1400_v38 = vpop.permute.xlu1 %1399  ;;  %v1398_v39 = vpop.permute.xlu0 %1397 }
 0x603   : > { %v1401_v40 = vsel %vm647_vm4, %v1398_v39, %v1400_v38 }
 0x604   : > { %1486 = vmatprep.subr.mxu0 %v1401_v40 }
 0x606   : > { %v1386_v41 = vpop.permute.xlu1 %1385  ;;  %v1396_v42 = vpop.permute.xlu0 %1395 }
 0x607   : > { %v1402_v43 = vsel %vm647_vm4, %v1396_v42, %v1398_v39  ;;  %v1403_v44 = vsel %vm647_vm4, %v1400_v38, %v1396_v42 }
 0x608   : > { %1487 = vmatpush1.msra.mxu0 %v1402_v43  ;;  %1970 = vmatpush3.msra.mxu1 %v1403_v44 }
 0x609   : > { %1971 = vmatprep.subr.mxu1 %v2219_v0 }
 0x60a   : > { %v1384_v45 = vpop.permute.xlu1 %1383  ;;  %v1388_v46 = vpop.permute.xlu0 %1387 }
 0x60b   : > { %v1390_v47 = vsel %vm634_vm5, %v1384_v45, %v1386_v41  ;;  %v1391_v48 = vsel %vm634_vm5, %v1388_v46, %v1384_v45  ;;  %v1389_v49 = vsel %vm634_vm5, %v1386_v41, %v1388_v46 }
 0x60c   : > { %1488 = vmatprep.subr.mxu0 %v1389_v49  ;;  %1972 = vmatpush3.msra.mxu1 %v1391_v48 }
 0x60d   : > { %1489 = vmatpush1.msra.mxu0 %v1390_v47  ;;  %1973 = vmatprep.subr.mxu1 %v2219_v0 }
 0x60e   : > { %v1371_v50 = vpop.permute.xlu1 %1370  ;;  %1490 = vmatprep.subr.mxu0 %v2759_v22  ;;  %1974 = vmatpush3.msra.mxu1 %v2762_v23  ;;  %v1369_v51 = vpop.permute.xlu0 %1368 }
 0x60f   : > { %1491 = vmatpush1.msra.mxu0 %v2769_v24  ;;  %v1375_v52 = vsel %vm618_vm6, %v1369_v51, %v1371_v50  ;;  %1975 = vmatprep.subr.mxu1 %v2219_v0 }
 0x610   : > { %1492 = vmatprep.subr.mxu0 %v1375_v52 }
 0x612   : > { %v1357_v53 = vpop.permute.xlu1 %1356  ;;  %v1373_v54 = vpop.permute.xlu0 %1372 }
 0x613   : > { %v1374_v55 = vsel %vm618_vm6, %v1371_v50, %v1373_v54  ;;  %v1376_v56 = vsel %vm618_vm6, %v1373_v54, %v1369_v51 }
 0x614   : > { %1493 = vmatpush1.msra.mxu0 %v1376_v56  ;;  %1976 = vmatpush3.msra.mxu1 %v1374_v55 }
 0x615   : > { %1977 = vmatprep.subr.mxu1 %v2219_v0 }
 0x616   : > { %v1361_v57 = vpop.permute.xlu1 %1360  ;;  %v1359_v58 = vpop.permute.xlu0 %1358 }
 0x617   : > { %v1364_v59 = vsel %vm605_vm7, %v1361_v57, %v1357_v53  ;;  %v1362_v60 = vsel %vm605_vm7, %v1359_v58, %v1361_v57  ;;  %v1363_v61 = vsel %vm605_vm7, %v1357_v53, %v1359_v58 }
 0x618   : > { %1494 = vmatprep.subr.mxu0 %v1363_v61  ;;  %1978 = vmatpush3.msra.mxu1 %v1362_v60 }
 0x619   : > { %1495 = vmatpush1.msra.mxu0 %v1364_v59  ;;  %1979 = vmatprep.subr.mxu1 %v2219_v0 }
 0x61a   : > { %v1347_v62 = vpop.permute.xlu1 %1346  ;;  %v1345_v63 = vpop.permute.xlu0 %1344 }
 0x61b   : > { %v1351_v1 = vsel %vm592_vm8, %v1345_v63, %v1347_v62 }
 0x61c   : > { %1496 = vmatprep.subr.mxu0 %v1351_v1 }
 0x61e   : > { %v1333_v2 = vpop.permute.xlu1 %1332  ;;  %v1349_v3 = vpop.permute.xlu0 %1348 }
 0x61f   : > { %v1350_v4 = vsel %vm592_vm8, %v1347_v62, %v1349_v3  ;;  %v1352_v5 = vsel %vm592_vm8, %v1349_v3, %v1345_v63 }
 0x620   : > { %1497 = vmatpush1.msra.mxu0 %v1352_v5  ;;  %1980 = vmatpush3.msra.mxu1 %v1350_v4 }
 0x621   : > { %1981 = vmatprep.subr.mxu1 %v2219_v0 }
 0x622   : > { %v1337_v6 = vpop.permute.xlu1 %1336  ;;  %v1335_v7 = vpop.permute.xlu0 %1334 }
 0x623   : > { %v1340_v9 = vsel %vm579_vm9, %v1337_v6, %v1333_v2  ;;  %v1338_v10 = vsel %vm579_vm9, %v1335_v7, %v1337_v6  ;;  %v1339_v11 = vsel %vm579_vm9, %v1333_v2, %v1335_v7 }
 0x624   : > { %1498 = vmatprep.subr.mxu0 %v1339_v11  ;;  %1982 = vmatpush3.msra.mxu1 %v1338_v10 }
 0x625   : > { %1499 = vmatpush1.msra.mxu0 %v1340_v9  ;;  %1984 = vmatmul.mubr.msk.f32.vlgmr.msra.gmra.mxu1 %vm714_vm10, %v1458_v8 }
 0x626   : > { %1884 = vmatmul.mubr.msk.f32.vlgmr.msra.gmra.mxu0 %vm714_vm10, %v1458_v8  ;;  %1650 = vmatprep.subr.mxu0 %v2090_v12 }
 0x627   : > { %1651 = vmatpush1.msra.mxu0 %v2091_v16  ;;  %1986 = vmatprep.subr.mxu1 %v2219_v0 }
 0x628   : > { %1987 = vmatpush3.msra.mxu1 %v2092_v14  ;;  %1988 = vmatprep.mubr.msk.f32.mxu1 %vm2226_vm0, %v2219_v0 }
 0x629   : > { %1684 = vmatprep.mubr.f32.mxu0 %v2219_v0  ;;  %1989 = vmatmul.mubr.msk.f32.vlgmr.msra.gmra.mxu1 %vm1616_vm11, %v1609_v15 }
 0x62a   : > { %1886 = vmatmul.mubr.msk.f32.vlgmr.msra.gmra.mxu0 %vm1616_vm11, %v1609_v15 }
 0x62f   : > { %v1614_v20 = vpop.permute.xlu1 %1613  ;;  %v1463_v22 = vpop.permute.xlu0 %1462 }
 0x6e5   : > { %v1605_v17 = vpop.f32.mrf.mxu1 }
 0x6e6   : > { %v1534_v18 = vpop.f32.mrf.mxu0  ;;  %v1606_v24 = vadd.f32 %v1605_v17, %v1463_v22 }
 0x6e7   : > { %v1985_v19 = vpop.f32.mrf.mxu1  ;;  %v1535_v37 = vadd.f32 %v1534_v18, %v1463_v22 }
 0x6e8   : > { %v1536_v21 = vpop.f32.mrf.mxu0 }
 0x6e9   : > { %v1757_v23 = vpop.f32.mrf.mxu1  ;;  %v1537_v13 = vadd.f32 %v1536_v21, %v1463_v22 }
 0x6ea   : > { %v1758_v25 = vadd.f32 %v1757_v23, %v1614_v20  ;;  %v1686_v33 = vpop.f32.mrf.mxu0 }
 0x6eb   : > { %v1687_v26 = vadd.f32 %v1686_v33, %v1614_v20  ;;  %v1990_v27 = vpop.f32.mrf.mxu1 }
 0x6ec   : > { %v1763_v0 = vadd.f32 %v1758_v25, %v1606_v24  ;;  %v1688_v28 = vpop.f32.mrf.mxu0 }
 0x6ed   : > { %v1761_v29 = vadd.f32 %v1687_v26, %v1535_v37  ;;  %v1689_v30 = vadd.f32 %v1688_v28, %v1614_v20 }
 0x6ee   : > { %1766 = vst [vmem:[%s561_s18 + $0x10] sm:$0xff] %v1763_v0 }
 0x6ef   : > { %1764 = vst [vmem:[%s561_s18] sm:$0xff] %v1761_v29  ;;  %v1762_v31 = vadd.f32 %v1689_v30, %v1537_v13 }
 0x6f1   : > { %1765 = vst [vmem:[%s561_s18 + $0x8] sm:$0xff] %v1762_v31 }
 0x6f2   : > { %2160 = shalt.err (!%p2157_p12)
}
 0x6f3   : > { %s2161_s14 = scalar_lea.hbm %s1780_s19, 384  ;;  %s2165_s29 = scalar_lea.hbm %s3000_s30, 768 }
 0x6f4   : > { %p2162_p5 = scmp.ne.s32.totalorder %s1780_s19, %s2161_s14  ;;  %p2166_p4 = scmp.lt.s32.totalorder %s1780_s19, %s3000_s30 }
 0x6f5   : > { %p2167_p8 = scmp.lt.s32.totalorder %s2165_s29, %s2161_s14 }
 0x6f6   : > { %p2163_p7 = pnand %p2162_p5, %p3001_p13 }
 0x6f7   : > { %p2168_p9 = por %p2167_p8, %p2166_p4 }
 0x6f8   : > { %p2164_p6 = pneg %p2163_p7 }
 0x6fa   : > { %p2169_p11 = pnand %p2168_p9, %p2164_p6 }
 0x6fc   : > { %2172 = shalt.err (!%p2169_p11)
}
 0x6fd   : > { %2012 = dma.vmem_to_hbm [thread:$0]  (%p3001_p13), %s1783_s20, 384, %s1780_s19, %s1768_s0  }
 0x6fe PF: > { %s3002_s26 = sld [smem:[#allocation12_spill]] }
 0x6ff   : > { %s3003_s21 = sld [smem:[#allocation15_spill]] }
 0x700   : > { %s3004_s24 = sld [smem:[#allocation14_spill]] }
 0x704   : > { %s1794_s25 = sand.u32 1, %s3002_s26  }
 0x705   : > { %p3005_p10 = scmp.ne.s32.totalorder %s3003_s21, 0  ;;  %s1795_s27 = scalar_lea.sflag [#allocation5], %s1794_s25 }
 0x706   : > { %p3006_p1 = scmp.ge.s32.totalorder %s3004_s24, 2 }
 0x708   : > { %p2023_p2 = pnand %p3006_p1, %p3005_p10 }
 0x70a   : > { %p2024_p0 = pneg %p2023_p2 }
 0x70c   : > { %2198 = dma.done.wait (%p2024_p0), %s1795_s27, 384  }
 0x70d   : > { %2200 = vsyncadd (%p2024_p0), %s1795_s27, 4294966912  ;;  %s3007_s24 = sld [smem:[#allocation16_spill]]  ;;  %s3010_s21 = smov %s2207_s22 }
 0x70e   : > { %s3008_s2 = sld [smem:[#allocation13_spill]] }
 0x70f   : > { %s3009_s23 = sld [smem:[#allocation17_spill]] }
 0x713   : > { %p30_p3 = scmp.ge.s32.totalorder %s3007_s24, 4  }
 0x714   : > { %s3011_s22 = smov %s3008_s2 }
 0x715   :  { %32 = sbr.rel (!%p30_p3) target bundleno = 11 (0xb), region = 136 }
 0x71a   :  { %1800 = vsyncpa [#allocation4], 1 }
 0x71b   :  { %1802 = vsyncpa [#allocation4 + $0x1], 1 }
 0x71c   :  { %1803 = vsyncpa [#allocation7], 1 }
 0x71d   :  { %1804 = vsyncpa [#allocation5], 1 }
 0x71e   :  { %1806 = vsyncpa [#allocation5 + $0x1], 1 }

</bundles_post_ra>
